<compile_context>
chip_gen: v7x
topology: tpu7x:2x2x1
jax: 0.10.0
libtpu: 0.0.40
codegen_flags: <defaults>
</compile_context>

<pallas_src>
import jax
import jax.numpy as jnp
import numpy as np
from jax.experimental import pallas as pl
from jax.experimental.pallas import tpu as pltpu

# Model hyper-parameters from the module instantiation:
#   CharRNN(alphabet_size=12, hidden=50, alphabet_size=12, 'lstm', n_layers=1)
ALPHABET = 12
HIDDEN = 50
OUTPUT = 12
N_LAYERS = 1

# Padded (lane/sublane aligned) sizes used inside the kernels.
HP = 128            # hidden padded to one full lane width
GP = 4 * HP         # fused gate width (i, f, g, o), each gate lane-aligned
OP = 128            # output padded
BP = 8              # batch padded to one sublane tile.  Pack independent
                    # sequences here (up to 128/256 rows ride the MXU nearly
                    # for free); on v7x a >1-tile batch should also get a
                    # leading "parallel" grid axis so the 2nd TC is used.

# MXU operand dtype.  Accumulation, h/c state and softmax remain float32.
MXU_DTYPE = jnp.bfloat16


# --------------------------------------------------------------------------
# Kernel 1: the LSTM recurrence (one time chunk per grid step).
# --------------------------------------------------------------------------
def lstm_seq_kernel(xproj_ref, wh_ref, h0_ref, c0_ref,
                    hs_ref, h1_ref, c1_ref):
    """xproj_ref : (TC, BP, GP) f32   precomputed  (E@Wx)[token] + b  per step
       wh_ref    : (HP, GP)     bf16  fused hidden->gates weight (VMEM resident)
       h0/c0_ref : (BP, HP)     f32   initial state
       hs_ref    : (TC, BP, HP) f32   every h_t of this chunk (feeds h2o pass)
       h1/c1_ref : (BP, HP)     f32   running/final state (accumulator block)
    """
    n = pl.program_id(0)

    @pl.when(n == 0)
    def _():
        h1_ref[...] = h0_ref[...]
        c1_ref[...] = c0_ref[...]

    wh = wh_ref[...]                    # loaded once, reused for every step
    tc = xproj_ref.shape[0]

    def step(h, c, xproj_t):
        # Only h @ Wh sits on the serial critical path; the input projection
        # (embedding folded into W_ih) and both biases are already in xproj_t.
        gates = jnp.dot(h.astype(wh.dtype), wh,
                        preferred_element_type=jnp.float32) + xproj_t
        i = jax.nn.sigmoid(gates[:, 0 * HP:1 * HP])
        f = jax.nn.sigmoid(gates[:, 1 * HP:2 * HP])
        g = jnp.tanh(gates[:, 2 * HP:3 * HP])
        o = jax.nn.sigmoid(gates[:, 3 * HP:4 * HP])
        c_new = f * c + i * g
        h_new = o * jnp.tanh(c_new)
        return h_new, c_new

    h = h1_ref[...]
    c = c1_ref[...]
    if tc <= 8:
        # Short chunk: full static unroll (static indices everywhere).
        for t in range(tc):
            h, c = step(h, c, xproj_ref[t])
            hs_ref[t] = h
    else:
        # Long chunk: bounded unroll keeps vreg pressure low.
        def body(t, carry):
            h, c = carry
            h, c = step(h, c, xproj_ref[t])
            hs_ref[t] = h
            return h, c
        unroll = 8 if tc % 8 == 0 else 1
        h, c = jax.lax.fori_loop(0, tc, body, (h, c), unroll=unroll)

    h1_ref[...] = h
    c1_ref[...] = c


# --------------------------------------------------------------------------
# Kernel 2: batched h2o + softmax, off the recurrent critical path.
# --------------------------------------------------------------------------
def h2o_softmax_kernel(hs_ref, who_ref, bo_ref, probs_ref):
    who = who_ref[...]
    # Padded output lanes carry bias -1e30 (f32) -> exp underflows to exactly
    # 0, so the normalization is exact over the real OUTPUT lanes.
    logits = jnp.dot(hs_ref[...].astype(who.dtype), who,
                     preferred_element_type=jnp.float32) + bo_ref[...]
    m = jnp.max(logits, axis=-1, keepdims=True)
    e = jnp.exp(logits - m)
    denom = jnp.sum(e, axis=-1, keepdims=True)
    probs_ref[...] = e * pl.reciprocal(denom, approx=True)


# --------------------------------------------------------------------------
# Wrappers.
# --------------------------------------------------------------------------
def char_rnn_forward_seq(tokens, h0, c0, padded_params, *, time_chunk=None):
    """Run T LSTM steps (== T sequential calls of the torch forward()).

    tokens: (T, B) int32; h0, c0: (N_LAYERS, B, HIDDEN) f32.
    Returns (probs (T, B, OUTPUT), (h1, c1) each (N_LAYERS, B, HIDDEN)).
    """
    T, B = tokens.shape
    assert B <= BP, "grow BP (and pad) for larger batches"
    TC = T if time_chunk is None else time_chunk
    assert T % TC == 0, "sequence length must be a multiple of the time chunk"
    n_chunks = T // TC
    p = padded_params

    # Host/XLA-side input projection (cheap gather + add), done once:
    #   xproj[t, b] = (E @ W_ih)[token[t, b]] + (b_ih + b_hh)
    tok_p = jnp.zeros((T, BP), jnp.int32).at[:, :B].set(tokens)
    xproj = p["ewx"][tok_p] + p["b"]                          # (T, BP, GP) f32

    h0_p = jnp.zeros((BP, HP), jnp.float32).at[:B, :HIDDEN].set(
        h0.reshape(B, HIDDEN))
    c0_p = jnp.zeros((BP, HP), jnp.float32).at[:B, :HIDDEN].set(
        c0.reshape(B, HIDDEN))

    const2d = lambda n: (0, 0)
    rec_grid = pltpu.PrefetchScalarGridSpec(
        num_scalar_prefetch=0,
        grid=(n_chunks,),
        in_specs=[
            pl.BlockSpec((TC, BP, GP), lambda n: (n, 0, 0)),   # xproj chunk
            pl.BlockSpec((HP, GP), const2d),                   # Wh (resident)
            pl.BlockSpec((BP, HP), const2d),                   # h0
            pl.BlockSpec((BP, HP), const2d),                   # c0
        ],
        out_specs=(
            pl.BlockSpec((TC, BP, HP), lambda n: (n, 0, 0)),   # all h_t
            pl.BlockSpec((BP, HP), const2d),                   # final h
            pl.BlockSpec((BP, HP), const2d),                   # final c
        ),
    )
    hs, h1_p, c1_p = pl.pallas_call(
        lstm_seq_kernel,
        out_shape=(
            jax.ShapeDtypeStruct((T, BP, HP), jnp.float32),
            jax.ShapeDtypeStruct((BP, HP), jnp.float32),
            jax.ShapeDtypeStruct((BP, HP), jnp.float32),
        ),
        grid_spec=rec_grid,
        compiler_params=pltpu.CompilerParams(
            dimension_semantics=("arbitrary",)),   # sequential recurrence
    )(xproj, p["wh"], h0_p, c0_p)

    # Deferred h2o + softmax over all T*BP rows in one batched kernel.
    rows = T * BP
    rb = rows
    for cand in (512, 256, 128, 64, 32, 16, 8):
        if rows % cand == 0:
            rb = cand
            break
    probs_flat = pl.pallas_call(
        h2o_softmax_kernel,
        out_shape=jax.ShapeDtypeStruct((rows, OP), jnp.float32),
        grid_spec=pltpu.PrefetchScalarGridSpec(
            num_scalar_prefetch=0,
            grid=(rows // rb,),
            in_specs=[
                pl.BlockSpec((rb, HP), lambda r: (r, 0)),      # h_t rows
                pl.BlockSpec((HP, OP), lambda r: (0, 0)),      # W_h2o
                pl.BlockSpec((1, OP), lambda r: (0, 0)),       # b_h2o (-1e30 pad)
            ],
            out_specs=pl.BlockSpec((rb, OP), lambda r: (r, 0))),
        compiler_params=pltpu.CompilerParams(
            dimension_semantics=("parallel",)),
    )(hs.reshape(rows, HP), p["who"], p["bo"])

    probs = probs_flat.reshape(T, BP, OP)[:, :B, :OUTPUT]
    h1 = h1_p[:B, :HIDDEN].reshape(N_LAYERS, B, HIDDEN)
    c1 = c1_p[:B, :HIDDEN].reshape(N_LAYERS, B, HIDDEN)
    return probs, (h1, c1)


def char_rnn_forward(tokens, hidden, padded_params):
    """Single-step forward matching CharRNN.forward(input, hidden) (T == 1)."""
    h0, c0 = hidden
    probs, new_hidden = char_rnn_forward_seq(tokens[None, :], h0, c0,
                                             padded_params)
    return probs[0], new_hidden


# --------------------------------------------------------------------------
# Parameters.
# --------------------------------------------------------------------------
def init_params(key):
    """Deterministic synthetic parameters in PyTorch layout (gate order i,f,g,o)."""
    H, V, O = HIDDEN, ALPHABET, OUTPUT
    k = jax.random.split(key, 7)
    s = 1.0 / np.sqrt(H)
    return dict(
        embed=jax.random.normal(k[0], (V, H), jnp.float32) * 0.1,       # Embedding.weight
        w_ih=jax.random.uniform(k[1], (4 * H, H), jnp.float32, -s, s),  # LSTM.weight_ih_l0
        w_hh=jax.random.uniform(k[2], (4 * H, H), jnp.float32, -s, s),  # LSTM.weight_hh_l0
        b_ih=jax.random.uniform(k[3], (4 * H,), jnp.float32, -s, s),    # LSTM.bias_ih_l0
        b_hh=jax.random.uniform(k[4], (4 * H,), jnp.float32, -s, s),    # LSTM.bias_hh_l0
        w_ho=jax.random.uniform(k[5], (O, H), jnp.float32, -s, s),      # h2o.weight
        b_ho=jax.random.uniform(k[6], (O,), jnp.float32, -s, s),        # h2o.bias
    )


def prepare_padded_params(p):
    """Fuse gate weights, fold the embedding into W_ih, pad lane-dense."""
    H, V, O = HIDDEN, ALPHABET, OUTPUT
    wx_cat = p["w_ih"].T                                     # (H, 4H)
    wh_cat = p["w_hh"].T                                     # (H, 4H)
    b_cat = p["b_ih"] + p["b_hh"]                            # (4H,)
    ewx_cat = jnp.dot(p["embed"], wx_cat,                    # (V, 4H) fold embed
                      precision=jax.lax.Precision.HIGHEST)

    ewx = jnp.zeros((V, GP), jnp.float32)     # gathered host-side, no V pad
    wh = jnp.zeros((HP, GP), jnp.float32)
    b = jnp.zeros((1, GP), jnp.float32)
    for k in range(4):                        # PyTorch gate order: i, f, g, o
        src = slice(k * H, (k + 1) * H)
        dst = slice(k * HP, k * HP + H)
        ewx = ewx.at[:, dst].set(ewx_cat[:, src])
        wh = wh.at[:H, dst].set(wh_cat[:, src])
        b = b.at[0, dst].set(b_cat[src])

    who = jnp.zeros((HP, OP), jnp.float32).at[:H, :O].set(p["w_ho"].T)
    bo = jnp.full((1, OP), -1e30, jnp.float32).at[0, :O].set(p["b_ho"])
    return dict(ewx=ewx, b=b,
                wh=wh.astype(MXU_DTYPE), who=who.astype(MXU_DTYPE), bo=bo)


# --------------------------------------------------------------------------
# Pure-JAX reference (T sequential applications of the torch forward()).
# --------------------------------------------------------------------------
def reference_forward_seq(tokens, h0, c0, p):
    T, B = tokens.shape
    H = HIDDEN
    h = h0.reshape(B, H)
    c = c0.reshape(B, H)
    probs = []
    for t in range(T):
        x = p["embed"][tokens[t]]                                    # (B, H)
        gates = x @ p["w_ih"].T + h @ p["w_hh"].T + p["b_ih"] + p["b_hh"]
        i = jax.nn.sigmoid(gates[:, 0 * H:1 * H])
        f = jax.nn.sigmoid(gates[:, 1 * H:2 * H])
        g = jnp.tanh(gates[:, 2 * H:3 * H])
        o = jax.nn.sigmoid(gates[:, 3 * H:4 * H])
        c = f * c + i * g
        h = o * jnp.tanh(c)
        logits = h @ p["w_ho"].T + p["b_ho"]
        probs.append(jax.nn.softmax(logits, axis=-1))
    return (jnp.stack(probs),
            h.reshape(N_LAYERS, B, H),
            c.reshape(N_LAYERS, B, H))


if __name__ == "__main__":
    key = jax.random.PRNGKey(0)
    kp, kt = jax.random.split(key)

    params = init_params(kp)
    padded = prepare_padded_params(params)

    B = 4          # forward() uses input.size(0), so any batch <= BP works
    T = 8          # whole sequence processed by a single kernel launch
    tokens = jax.random.randint(kt, (T, B), 0, ALPHABET, dtype=jnp.int32)
    # Host-side range check (torch.nn.Embedding would raise on bad ids).
    assert int(jnp.min(tokens)) >= 0 and int(jnp.max(tokens)) < ALPHABET
    h0 = jnp.zeros((N_LAYERS, B, HIDDEN), jnp.float32)   # init_hidden (lstm)
    c0 = jnp.zeros((N_LAYERS, B, HIDDEN), jnp.float32)

    probs, (h1, c1) = char_rnn_forward_seq(tokens, h0, c0, padded)
    jax.block_until_ready((probs, h1, c1))

    ref_probs, ref_h1, ref_c1 = reference_forward_seq(tokens, h0, c0, params)
    # Tolerances account for bf16 MXU operands (accumulation stays f32), the
    # host-side embedding fold, and pl.reciprocal(approx=True) in the softmax.
    np.testing.assert_allclose(np.asarray(probs), np.asarray(ref_probs),
                               rtol=1e-2, atol=1e-2)
    np.testing.assert_allclose(np.asarray(h1), np.asarray(ref_h1),
                               rtol=1e-2, atol=1e-2)
    np.testing.assert_allclose(np.asarray(c1), np.asarray(ref_c1),
                               rtol=1e-2, atol=1e-2)

    # Also exercise the module-identical single-step path (T == 1).
    p1, (h_s, c_s) = char_rnn_forward(tokens[0], (h0, c0), padded)
    jax.block_until_ready((p1, h_s, c_s))

    print("KERNEL_OK")
</pallas_src>

<mosaic_0001>
module attributes {stable_mosaic.version = 11 : i64} {
  func.func @lstm_seq_kernel(%arg0: i32, %arg1: memref<8x8x512xf32, #tpu.memory_space<vmem>>, %arg2: memref<128x512xbf16, #tpu.memory_space<vmem>>, %arg3: memref<8x128xf32, #tpu.memory_space<vmem>>, %arg4: memref<8x128xf32, #tpu.memory_space<vmem>>, %arg5: memref<8x8x128xf32, #tpu.memory_space<vmem>>, %arg6: memref<8x128xf32, #tpu.memory_space<vmem>>, %arg7: memref<8x128xf32, #tpu.memory_space<vmem>>) attributes {dimension_semantics = [#tpu.dimension_semantics<arbitrary>], iteration_bounds = array<i64: 1>, scalar_prefetch = 0 : i64, scratch_operands = 0 : i64, tpu.core_type = #tpu.core_type<tc>, window_params = [{transform_indices = @transform_0, window_bounds = array<i64: 8, 8, 512>}, {pipeline_mode = #tpu.pipeline_mode<synchronous>, transform_indices = @transform_1, window_bounds = array<i64: 128, 512>}, {pipeline_mode = #tpu.pipeline_mode<synchronous>, transform_indices = @transform_2, window_bounds = array<i64: 8, 128>}, {pipeline_mode = #tpu.pipeline_mode<synchronous>, transform_indices = @transform_3, window_bounds = array<i64: 8, 128>}, {transform_indices = @transform_4, window_bounds = array<i64: 8, 8, 128>}, {pipeline_mode = #tpu.pipeline_mode<synchronous>, transform_indices = @transform_5, window_bounds = array<i64: 8, 128>}, {pipeline_mode = #tpu.pipeline_mode<synchronous>, transform_indices = @transform_6, window_bounds = array<i64: 8, 128>}]} {
    %c0_i32 = arith.constant 0 : i32
    %0 = arith.cmpi eq, %arg0, %c0_i32 : i32
    %1 = arith.extui %0 : i1 to i32
    %c0_i32_0 = arith.constant 0 : i32
    %2 = arith.cmpi ne, %1, %c0_i32_0 : i32
    scf.if %2 {
      %c0_82 = arith.constant 0 : index
      %c0_83 = arith.constant 0 : index
      %272 = vector.load %arg3[%c0_82, %c0_83] : memref<8x128xf32, #tpu.memory_space<vmem>>, vector<8x128xf32>
      %c0_84 = arith.constant 0 : index
      %c0_85 = arith.constant 0 : index
      %273 = vector.load %arg6[%c0_84, %c0_85] : memref<8x128xf32, #tpu.memory_space<vmem>>, vector<8x128xf32>
      tpu.vector_store %arg6[%c0_84, %c0_85], %272 {strides = array<i32>} : memref<8x128xf32, #tpu.memory_space<vmem>>, vector<8x128xf32>,
      %c0_86 = arith.constant 0 : index
      %c0_87 = arith.constant 0 : index
      %274 = vector.load %arg4[%c0_86, %c0_87] : memref<8x128xf32, #tpu.memory_space<vmem>>, vector<8x128xf32>
      %c0_88 = arith.constant 0 : index
      %c0_89 = arith.constant 0 : index
      %275 = vector.load %arg7[%c0_88, %c0_89] : memref<8x128xf32, #tpu.memory_space<vmem>>, vector<8x128xf32>
      tpu.vector_store %arg7[%c0_88, %c0_89], %274 {strides = array<i32>} : memref<8x128xf32, #tpu.memory_space<vmem>>, vector<8x128xf32>,
    } else {
    }
    %c0 = arith.constant 0 : index
    %c0_1 = arith.constant 0 : index
    %3 = vector.load %arg2[%c0, %c0_1] : memref<128x512xbf16, #tpu.memory_space<vmem>>, vector<128x512xbf16>
    %c0_2 = arith.constant 0 : index
    %c0_3 = arith.constant 0 : index
    %4 = vector.load %arg6[%c0_2, %c0_3] : memref<8x128xf32, #tpu.memory_space<vmem>>, vector<8x128xf32>
    %c0_4 = arith.constant 0 : index
    %c0_5 = arith.constant 0 : index
    %5 = vector.load %arg7[%c0_4, %c0_5] : memref<8x128xf32, #tpu.memory_space<vmem>>, vector<8x128xf32>
    %c0_6 = arith.constant 0 : index
    %c0_7 = arith.constant 0 : index
    %c0_8 = arith.constant 0 : index
    %6 = vector.load %arg1[%c0_6, %c0_7, %c0_8] : memref<8x8x512xf32, #tpu.memory_space<vmem>>, vector<1x8x512xf32>
    %7 = vector.shape_cast %6 : vector<1x8x512xf32> to vector<8x512xf32>
    %8 = arith.truncf %4 : vector<8x128xf32> to vector<8x128xbf16>
    %cst = arith.constant dense<0.000000e+00> : vector<8x512xf32>
    %9 = tpu.matmul %8, %3, %cst {dimension_numbers = #tpu.dot_dimension_numbers<[1], [0], [0], [1], [0, 0, 1, 1], [], []>} : vector<8x128xbf16>, vector<128x512xbf16>, vector<8x512xf32> -> vector<8x512xf32>
    %10 = arith.addf %9, %7 : vector<8x512xf32>
    %11 = vector.extract_strided_slice %10 {offsets = [0, 0], sizes = [8, 128], strides = [1, 1]} : vector<8x512xf32> to vector<8x128xf32>
    %12 = arith.negf %11 : vector<8x128xf32>
    %13 = math.exp %12 : vector<8x128xf32>
    %cst_9 = arith.constant 1.000000e+00 : f32
    %14 = vector.broadcast %cst_9 : f32 to vector<8x128xf32>
    %15 = arith.addf %14, %13 : vector<8x128xf32>
    %16 = arith.divf %14, %15 : vector<8x128xf32>
    %17 = vector.extract_strided_slice %10 {offsets = [0, 128], sizes = [8, 128], strides = [1, 1]} : vector<8x512xf32> to vector<8x128xf32>
    %18 = arith.negf %17 : vector<8x128xf32>
    %19 = math.exp %18 : vector<8x128xf32>
    %cst_10 = arith.constant 1.000000e+00 : f32
    %20 = vector.broadcast %cst_10 : f32 to vector<8x128xf32>
    %21 = arith.addf %20, %19 : vector<8x128xf32>
    %22 = arith.divf %20, %21 : vector<8x128xf32>
    %23 = vector.extract_strided_slice %10 {offsets = [0, 256], sizes = [8, 128], strides = [1, 1]} : vector<8x512xf32> to vector<8x128xf32>
    %24 = math.tanh %23 : vector<8x128xf32>
    %25 = vector.extract_strided_slice %10 {offsets = [0, 384], sizes = [8, 128], strides = [1, 1]} : vector<8x512xf32> to vector<8x128xf32>
    %26 = arith.negf %25 : vector<8x128xf32>
    %27 = math.exp %26 : vector<8x128xf32>
    %cst_11 = arith.constant 1.000000e+00 : f32
    %28 = vector.broadcast %cst_11 : f32 to vector<8x128xf32>
    %29 = arith.addf %28, %27 : vector<8x128xf32>
    %30 = arith.divf %28, %29 : vector<8x128xf32>
    %31 = arith.mulf %22, %5 : vector<8x128xf32>
    %32 = arith.mulf %16, %24 : vector<8x128xf32>
    %33 = arith.addf %31, %32 : vector<8x128xf32>
    %34 = math.tanh %33 : vector<8x128xf32>
    %35 = arith.mulf %30, %34 : vector<8x128xf32>
    %c0_12 = arith.constant 0 : index
    %c0_13 = arith.constant 0 : index
    %c0_14 = arith.constant 0 : index
    %36 = vector.load %arg5[%c0_12, %c0_13, %c0_14] : memref<8x8x128xf32, #tpu.memory_space<vmem>>, vector<1x8x128xf32>
    %37 = vector.shape_cast %36 : vector<1x8x128xf32> to vector<8x128xf32>
    %38 = vector.shape_cast %35 : vector<8x128xf32> to vector<1x8x128xf32>
    tpu.vector_store %arg5[%c0_12, %c0_13, %c0_14], %38 {strides = array<i32>} : memref<8x8x128xf32, #tpu.memory_space<vmem>>, vector<1x8x128xf32>,
    %c1 = arith.constant 1 : index
    %c0_15 = arith.constant 0 : index
    %c0_16 = arith.constant 0 : index
    %39 = vector.load %arg1[%c1, %c0_15, %c0_16] : memref<8x8x512xf32, #tpu.memory_space<vmem>>, vector<1x8x512xf32>
    %40 = vector.shape_cast %39 : vector<1x8x512xf32> to vector<8x512xf32>
    %41 = arith.truncf %35 : vector<8x128xf32> to vector<8x128xbf16>
    %cst_17 = arith.constant dense<0.000000e+00> : vector<8x512xf32>
    %42 = tpu.matmul %41, %3, %cst_17 {dimension_numbers = #tpu.dot_dimension_numbers<[1], [0], [0], [1], [0, 0, 1, 1], [], []>} : vector<8x128xbf16>, vector<128x512xbf16>, vector<8x512xf32> -> vector<8x512xf32>
    %43 = arith.addf %42, %40 : vector<8x512xf32>
    %44 = vector.extract_strided_slice %43 {offsets = [0, 0], sizes = [8, 128], strides = [1, 1]} : vector<8x512xf32> to vector<8x128xf32>
    %45 = arith.negf %44 : vector<8x128xf32>
    %46 = math.exp %45 : vector<8x128xf32>
    %cst_18 = arith.constant 1.000000e+00 : f32
    %47 = vector.broadcast %cst_18 : f32 to vector<8x128xf32>
    %48 = arith.addf %47, %46 : vector<8x128xf32>
    %49 = arith.divf %47, %48 : vector<8x128xf32>
    %50 = vector.extract_strided_slice %43 {offsets = [0, 128], sizes = [8, 128], strides = [1, 1]} : vector<8x512xf32> to vector<8x128xf32>
    %51 = arith.negf %50 : vector<8x128xf32>
    %52 = math.exp %51 : vector<8x128xf32>
    %cst_19 = arith.constant 1.000000e+00 : f32
    %53 = vector.broadcast %cst_19 : f32 to vector<8x128xf32>
    %54 = arith.addf %53, %52 : vector<8x128xf32>
    %55 = arith.divf %53, %54 : vector<8x128xf32>
    %56 = vector.extract_strided_slice %43 {offsets = [0, 256], sizes = [8, 128], strides = [1, 1]} : vector<8x512xf32> to vector<8x128xf32>
    %57 = math.tanh %56 : vector<8x128xf32>
    %58 = vector.extract_strided_slice %43 {offsets = [0, 384], sizes = [8, 128], strides = [1, 1]} : vector<8x512xf32> to vector<8x128xf32>
    %59 = arith.negf %58 : vector<8x128xf32>
    %60 = math.exp %59 : vector<8x128xf32>
    %cst_20 = arith.constant 1.000000e+00 : f32
    %61 = vector.broadcast %cst_20 : f32 to vector<8x128xf32>
    %62 = arith.addf %61, %60 : vector<8x128xf32>
    %63 = arith.divf %61, %62 : vector<8x128xf32>
    %64 = arith.mulf %55, %33 : vector<8x128xf32>
    %65 = arith.mulf %49, %57 : vector<8x128xf32>
    %66 = arith.addf %64, %65 : vector<8x128xf32>
    %67 = math.tanh %66 : vector<8x128xf32>
    %68 = arith.mulf %63, %67 : vector<8x128xf32>
    %c1_21 = arith.constant 1 : index
    %c0_22 = arith.constant 0 : index
    %c0_23 = arith.constant 0 : index
    %69 = vector.load %arg5[%c1_21, %c0_22, %c0_23] : memref<8x8x128xf32, #tpu.memory_space<vmem>>, vector<1x8x128xf32>
    %70 = vector.shape_cast %69 : vector<1x8x128xf32> to vector<8x128xf32>
    %71 = vector.shape_cast %68 : vector<8x128xf32> to vector<1x8x128xf32>
    tpu.vector_store %arg5[%c1_21, %c0_22, %c0_23], %71 {strides = array<i32>} : memref<8x8x128xf32, #tpu.memory_space<vmem>>, vector<1x8x128xf32>,
    %c2 = arith.constant 2 : index
    %c0_24 = arith.constant 0 : index
    %c0_25 = arith.constant 0 : index
    %72 = vector.load %arg1[%c2, %c0_24, %c0_25] : memref<8x8x512xf32, #tpu.memory_space<vmem>>, vector<1x8x512xf32>
    %73 = vector.shape_cast %72 : vector<1x8x512xf32> to vector<8x512xf32>
    %74 = arith.truncf %68 : vector<8x128xf32> to vector<8x128xbf16>
    %cst_26 = arith.constant dense<0.000000e+00> : vector<8x512xf32>
    %75 = tpu.matmul %74, %3, %cst_26 {dimension_numbers = #tpu.dot_dimension_numbers<[1], [0], [0], [1], [0, 0, 1, 1], [], []>} : vector<8x128xbf16>, vector<128x512xbf16>, vector<8x512xf32> -> vector<8x512xf32>
    %76 = arith.addf %75, %73 : vector<8x512xf32>
    %77 = vector.extract_strided_slice %76 {offsets = [0, 0], sizes = [8, 128], strides = [1, 1]} : vector<8x512xf32> to vector<8x128xf32>
    %78 = arith.negf %77 : vector<8x128xf32>
    %79 = math.exp %78 : vector<8x128xf32>
    %cst_27 = arith.constant 1.000000e+00 : f32
    %80 = vector.broadcast %cst_27 : f32 to vector<8x128xf32>
    %81 = arith.addf %80, %79 : vector<8x128xf32>
    %82 = arith.divf %80, %81 : vector<8x128xf32>
    %83 = vector.extract_strided_slice %76 {offsets = [0, 128], sizes = [8, 128], strides = [1, 1]} : vector<8x512xf32> to vector<8x128xf32>
    %84 = arith.negf %83 : vector<8x128xf32>
    %85 = math.exp %84 : vector<8x128xf32>
    %cst_28 = arith.constant 1.000000e+00 : f32
    %86 = vector.broadcast %cst_28 : f32 to vector<8x128xf32>
    %87 = arith.addf %86, %85 : vector<8x128xf32>
    %88 = arith.divf %86, %87 : vector<8x128xf32>
    %89 = vector.extract_strided_slice %76 {offsets = [0, 256], sizes = [8, 128], strides = [1, 1]} : vector<8x512xf32> to vector<8x128xf32>
    %90 = math.tanh %89 : vector<8x128xf32>
    %91 = vector.extract_strided_slice %76 {offsets = [0, 384], sizes = [8, 128], strides = [1, 1]} : vector<8x512xf32> to vector<8x128xf32>
    %92 = arith.negf %91 : vector<8x128xf32>
    %93 = math.exp %92 : vector<8x128xf32>
    %cst_29 = arith.constant 1.000000e+00 : f32
    %94 = vector.broadcast %cst_29 : f32 to vector<8x128xf32>
    %95 = arith.addf %94, %93 : vector<8x128xf32>
    %96 = arith.divf %94, %95 : vector<8x128xf32>
    %97 = arith.mulf %88, %66 : vector<8x128xf32>
    %98 = arith.mulf %82, %90 : vector<8x128xf32>
    %99 = arith.addf %97, %98 : vector<8x128xf32>
    %100 = math.tanh %99 : vector<8x128xf32>
    %101 = arith.mulf %96, %100 : vector<8x128xf32>
    %c2_30 = arith.constant 2 : index
    %c0_31 = arith.constant 0 : index
    %c0_32 = arith.constant 0 : index
    %102 = vector.load %arg5[%c2_30, %c0_31, %c0_32] : memref<8x8x128xf32, #tpu.memory_space<vmem>>, vector<1x8x128xf32>
    %103 = vector.shape_cast %102 : vector<1x8x128xf32> to vector<8x128xf32>
    %104 = vector.shape_cast %101 : vector<8x128xf32> to vector<1x8x128xf32>
    tpu.vector_store %arg5[%c2_30, %c0_31, %c0_32], %104 {strides = array<i32>} : memref<8x8x128xf32, #tpu.memory_space<vmem>>, vector<1x8x128xf32>,
    %c3 = arith.constant 3 : index
    %c0_33 = arith.constant 0 : index
    %c0_34 = arith.constant 0 : index
    %105 = vector.load %arg1[%c3, %c0_33, %c0_34] : memref<8x8x512xf32, #tpu.memory_space<vmem>>, vector<1x8x512xf32>
    %106 = vector.shape_cast %105 : vector<1x8x512xf32> to vector<8x512xf32>
    %107 = arith.truncf %101 : vector<8x128xf32> to vector<8x128xbf16>
    %cst_35 = arith.constant dense<0.000000e+00> : vector<8x512xf32>
    %108 = tpu.matmul %107, %3, %cst_35 {dimension_numbers = #tpu.dot_dimension_numbers<[1], [0], [0], [1], [0, 0, 1, 1], [], []>} : vector<8x128xbf16>, vector<128x512xbf16>, vector<8x512xf32> -> vector<8x512xf32>
    %109 = arith.addf %108, %106 : vector<8x512xf32>
    %110 = vector.extract_strided_slice %109 {offsets = [0, 0], sizes = [8, 128], strides = [1, 1]} : vector<8x512xf32> to vector<8x128xf32>
    %111 = arith.negf %110 : vector<8x128xf32>
    %112 = math.exp %111 : vector<8x128xf32>
    %cst_36 = arith.constant 1.000000e+00 : f32
    %113 = vector.broadcast %cst_36 : f32 to vector<8x128xf32>
    %114 = arith.addf %113, %112 : vector<8x128xf32>
    %115 = arith.divf %113, %114 : vector<8x128xf32>
    %116 = vector.extract_strided_slice %109 {offsets = [0, 128], sizes = [8, 128], strides = [1, 1]} : vector<8x512xf32> to vector<8x128xf32>
    %117 = arith.negf %116 : vector<8x128xf32>
    %118 = math.exp %117 : vector<8x128xf32>
    %cst_37 = arith.constant 1.000000e+00 : f32
    %119 = vector.broadcast %cst_37 : f32 to vector<8x128xf32>
    %120 = arith.addf %119, %118 : vector<8x128xf32>
    %121 = arith.divf %119, %120 : vector<8x128xf32>
    %122 = vector.extract_strided_slice %109 {offsets = [0, 256], sizes = [8, 128], strides = [1, 1]} : vector<8x512xf32> to vector<8x128xf32>
    %123 = math.tanh %122 : vector<8x128xf32>
    %124 = vector.extract_strided_slice %109 {offsets = [0, 384], sizes = [8, 128], strides = [1, 1]} : vector<8x512xf32> to vector<8x128xf32>
    %125 = arith.negf %124 : vector<8x128xf32>
    %126 = math.exp %125 : vector<8x128xf32>
    %cst_38 = arith.constant 1.000000e+00 : f32
    %127 = vector.broadcast %cst_38 : f32 to vector<8x128xf32>
    %128 = arith.addf %127, %126 : vector<8x128xf32>
    %129 = arith.divf %127, %128 : vector<8x128xf32>
    %130 = arith.mulf %121, %99 : vector<8x128xf32>
    %131 = arith.mulf %115, %123 : vector<8x128xf32>
    %132 = arith.addf %130, %131 : vector<8x128xf32>
    %133 = math.tanh %132 : vector<8x128xf32>
    %134 = arith.mulf %129, %133 : vector<8x128xf32>
    %c3_39 = arith.constant 3 : index
    %c0_40 = arith.constant 0 : index
    %c0_41 = arith.constant 0 : index
    %135 = vector.load %arg5[%c3_39, %c0_40, %c0_41] : memref<8x8x128xf32, #tpu.memory_space<vmem>>, vector<1x8x128xf32>
    %136 = vector.shape_cast %135 : vector<1x8x128xf32> to vector<8x128xf32>
    %137 = vector.shape_cast %134 : vector<8x128xf32> to vector<1x8x128xf32>
    tpu.vector_store %arg5[%c3_39, %c0_40, %c0_41], %137 {strides = array<i32>} : memref<8x8x128xf32, #tpu.memory_space<vmem>>, vector<1x8x128xf32>,
    %c4 = arith.constant 4 : index
    %c0_42 = arith.constant 0 : index
    %c0_43 = arith.constant 0 : index
    %138 = vector.load %arg1[%c4, %c0_42, %c0_43] : memref<8x8x512xf32, #tpu.memory_space<vmem>>, vector<1x8x512xf32>
    %139 = vector.shape_cast %138 : vector<1x8x512xf32> to vector<8x512xf32>
    %140 = arith.truncf %134 : vector<8x128xf32> to vector<8x128xbf16>
    %cst_44 = arith.constant dense<0.000000e+00> : vector<8x512xf32>
    %141 = tpu.matmul %140, %3, %cst_44 {dimension_numbers = #tpu.dot_dimension_numbers<[1], [0], [0], [1], [0, 0, 1, 1], [], []>} : vector<8x128xbf16>, vector<128x512xbf16>, vector<8x512xf32> -> vector<8x512xf32>
    %142 = arith.addf %141, %139 : vector<8x512xf32>
    %143 = vector.extract_strided_slice %142 {offsets = [0, 0], sizes = [8, 128], strides = [1, 1]} : vector<8x512xf32> to vector<8x128xf32>
    %144 = arith.negf %143 : vector<8x128xf32>
    %145 = math.exp %144 : vector<8x128xf32>
    %cst_45 = arith.constant 1.000000e+00 : f32
    %146 = vector.broadcast %cst_45 : f32 to vector<8x128xf32>
    %147 = arith.addf %146, %145 : vector<8x128xf32>
    %148 = arith.divf %146, %147 : vector<8x128xf32>
    %149 = vector.extract_strided_slice %142 {offsets = [0, 128], sizes = [8, 128], strides = [1, 1]} : vector<8x512xf32> to vector<8x128xf32>
    %150 = arith.negf %149 : vector<8x128xf32>
    %151 = math.exp %150 : vector<8x128xf32>
    %cst_46 = arith.constant 1.000000e+00 : f32
    %152 = vector.broadcast %cst_46 : f32 to vector<8x128xf32>
    %153 = arith.addf %152, %151 : vector<8x128xf32>
    %154 = arith.divf %152, %153 : vector<8x128xf32>
    %155 = vector.extract_strided_slice %142 {offsets = [0, 256], sizes = [8, 128], strides = [1, 1]} : vector<8x512xf32> to vector<8x128xf32>
    %156 = math.tanh %155 : vector<8x128xf32>
    %157 = vector.extract_strided_slice %142 {offsets = [0, 384], sizes = [8, 128], strides = [1, 1]} : vector<8x512xf32> to vector<8x128xf32>
    %158 = arith.negf %157 : vector<8x128xf32>
    %159 = math.exp %158 : vector<8x128xf32>
    %cst_47 = arith.constant 1.000000e+00 : f32
    %160 = vector.broadcast %cst_47 : f32 to vector<8x128xf32>
    %161 = arith.addf %160, %159 : vector<8x128xf32>
    %162 = arith.divf %160, %161 : vector<8x128xf32>
    %163 = arith.mulf %154, %132 : vector<8x128xf32>
    %164 = arith.mulf %148, %156 : vector<8x128xf32>
    %165 = arith.addf %163, %164 : vector<8x128xf32>
    %166 = math.tanh %165 : vector<8x128xf32>
    %167 = arith.mulf %162, %166 : vector<8x128xf32>
    %c4_48 = arith.constant 4 : index
    %c0_49 = arith.constant 0 : index
    %c0_50 = arith.constant 0 : index
    %168 = vector.load %arg5[%c4_48, %c0_49, %c0_50] : memref<8x8x128xf32, #tpu.memory_space<vmem>>, vector<1x8x128xf32>
    %169 = vector.shape_cast %168 : vector<1x8x128xf32> to vector<8x128xf32>
    %170 = vector.shape_cast %167 : vector<8x128xf32> to vector<1x8x128xf32>
    tpu.vector_store %arg5[%c4_48, %c0_49, %c0_50], %170 {strides = array<i32>} : memref<8x8x128xf32, #tpu.memory_space<vmem>>, vector<1x8x128xf32>,
    %c5 = arith.constant 5 : index
    %c0_51 = arith.constant 0 : index
    %c0_52 = arith.constant 0 : index
    %171 = vector.load %arg1[%c5, %c0_51, %c0_52] : memref<8x8x512xf32, #tpu.memory_space<vmem>>, vector<1x8x512xf32>
    %172 = vector.shape_cast %171 : vector<1x8x512xf32> to vector<8x512xf32>
    %173 = arith.truncf %167 : vector<8x128xf32> to vector<8x128xbf16>
    %cst_53 = arith.constant dense<0.000000e+00> : vector<8x512xf32>
    %174 = tpu.matmul %173, %3, %cst_53 {dimension_numbers = #tpu.dot_dimension_numbers<[1], [0], [0], [1], [0, 0, 1, 1], [], []>} : vector<8x128xbf16>, vector<128x512xbf16>, vector<8x512xf32> -> vector<8x512xf32>
    %175 = arith.addf %174, %172 : vector<8x512xf32>
    %176 = vector.extract_strided_slice %175 {offsets = [0, 0], sizes = [8, 128], strides = [1, 1]} : vector<8x512xf32> to vector<8x128xf32>
    %177 = arith.negf %176 : vector<8x128xf32>
    %178 = math.exp %177 : vector<8x128xf32>
    %cst_54 = arith.constant 1.000000e+00 : f32
    %179 = vector.broadcast %cst_54 : f32 to vector<8x128xf32>
    %180 = arith.addf %179, %178 : vector<8x128xf32>
    %181 = arith.divf %179, %180 : vector<8x128xf32>
    %182 = vector.extract_strided_slice %175 {offsets = [0, 128], sizes = [8, 128], strides = [1, 1]} : vector<8x512xf32> to vector<8x128xf32>
    %183 = arith.negf %182 : vector<8x128xf32>
    %184 = math.exp %183 : vector<8x128xf32>
    %cst_55 = arith.constant 1.000000e+00 : f32
    %185 = vector.broadcast %cst_55 : f32 to vector<8x128xf32>
    %186 = arith.addf %185, %184 : vector<8x128xf32>
    %187 = arith.divf %185, %186 : vector<8x128xf32>
    %188 = vector.extract_strided_slice %175 {offsets = [0, 256], sizes = [8, 128], strides = [1, 1]} : vector<8x512xf32> to vector<8x128xf32>
    %189 = math.tanh %188 : vector<8x128xf32>
    %190 = vector.extract_strided_slice %175 {offsets = [0, 384], sizes = [8, 128], strides = [1, 1]} : vector<8x512xf32> to vector<8x128xf32>
    %191 = arith.negf %190 : vector<8x128xf32>
    %192 = math.exp %191 : vector<8x128xf32>
    %cst_56 = arith.constant 1.000000e+00 : f32
    %193 = vector.broadcast %cst_56 : f32 to vector<8x128xf32>
    %194 = arith.addf %193, %192 : vector<8x128xf32>
    %195 = arith.divf %193, %194 : vector<8x128xf32>
    %196 = arith.mulf %187, %165 : vector<8x128xf32>
    %197 = arith.mulf %181, %189 : vector<8x128xf32>
    %198 = arith.addf %196, %197 : vector<8x128xf32>
    %199 = math.tanh %198 : vector<8x128xf32>
    %200 = arith.mulf %195, %199 : vector<8x128xf32>
    %c5_57 = arith.constant 5 : index
    %c0_58 = arith.constant 0 : index
    %c0_59 = arith.constant 0 : index
    %201 = vector.load %arg5[%c5_57, %c0_58, %c0_59] : memref<8x8x128xf32, #tpu.memory_space<vmem>>, vector<1x8x128xf32>
    %202 = vector.shape_cast %201 : vector<1x8x128xf32> to vector<8x128xf32>
    %203 = vector.shape_cast %200 : vector<8x128xf32> to vector<1x8x128xf32>
    tpu.vector_store %arg5[%c5_57, %c0_58, %c0_59], %203 {strides = array<i32>} : memref<8x8x128xf32, #tpu.memory_space<vmem>>, vector<1x8x128xf32>,
    %c6 = arith.constant 6 : index
    %c0_60 = arith.constant 0 : index
    %c0_61 = arith.constant 0 : index
    %204 = vector.load %arg1[%c6, %c0_60, %c0_61] : memref<8x8x512xf32, #tpu.memory_space<vmem>>, vector<1x8x512xf32>
    %205 = vector.shape_cast %204 : vector<1x8x512xf32> to vector<8x512xf32>
    %206 = arith.truncf %200 : vector<8x128xf32> to vector<8x128xbf16>
    %cst_62 = arith.constant dense<0.000000e+00> : vector<8x512xf32>
    %207 = tpu.matmul %206, %3, %cst_62 {dimension_numbers = #tpu.dot_dimension_numbers<[1], [0], [0], [1], [0, 0, 1, 1], [], []>} : vector<8x128xbf16>, vector<128x512xbf16>, vector<8x512xf32> -> vector<8x512xf32>
    %208 = arith.addf %207, %205 : vector<8x512xf32>
    %209 = vector.extract_strided_slice %208 {offsets = [0, 0], sizes = [8, 128], strides = [1, 1]} : vector<8x512xf32> to vector<8x128xf32>
    %210 = arith.negf %209 : vector<8x128xf32>
    %211 = math.exp %210 : vector<8x128xf32>
    %cst_63 = arith.constant 1.000000e+00 : f32
    %212 = vector.broadcast %cst_63 : f32 to vector<8x128xf32>
    %213 = arith.addf %212, %211 : vector<8x128xf32>
    %214 = arith.divf %212, %213 : vector<8x128xf32>
    %215 = vector.extract_strided_slice %208 {offsets = [0, 128], sizes = [8, 128], strides = [1, 1]} : vector<8x512xf32> to vector<8x128xf32>
    %216 = arith.negf %215 : vector<8x128xf32>
    %217 = math.exp %216 : vector<8x128xf32>
    %cst_64 = arith.constant 1.000000e+00 : f32
    %218 = vector.broadcast %cst_64 : f32 to vector<8x128xf32>
    %219 = arith.addf %218, %217 : vector<8x128xf32>
    %220 = arith.divf %218, %219 : vector<8x128xf32>
    %221 = vector.extract_strided_slice %208 {offsets = [0, 256], sizes = [8, 128], strides = [1, 1]} : vector<8x512xf32> to vector<8x128xf32>
    %222 = math.tanh %221 : vector<8x128xf32>
    %223 = vector.extract_strided_slice %208 {offsets = [0, 384], sizes = [8, 128], strides = [1, 1]} : vector<8x512xf32> to vector<8x128xf32>
    %224 = arith.negf %223 : vector<8x128xf32>
    %225 = math.exp %224 : vector<8x128xf32>
    %cst_65 = arith.constant 1.000000e+00 : f32
    %226 = vector.broadcast %cst_65 : f32 to vector<8x128xf32>
    %227 = arith.addf %226, %225 : vector<8x128xf32>
    %228 = arith.divf %226, %227 : vector<8x128xf32>
    %229 = arith.mulf %220, %198 : vector<8x128xf32>
    %230 = arith.mulf %214, %222 : vector<8x128xf32>
    %231 = arith.addf %229, %230 : vector<8x128xf32>
    %232 = math.tanh %231 : vector<8x128xf32>
    %233 = arith.mulf %228, %232 : vector<8x128xf32>
    %c6_66 = arith.constant 6 : index
    %c0_67 = arith.constant 0 : index
    %c0_68 = arith.constant 0 : index
    %234 = vector.load %arg5[%c6_66, %c0_67, %c0_68] : memref<8x8x128xf32, #tpu.memory_space<vmem>>, vector<1x8x128xf32>
    %235 = vector.shape_cast %234 : vector<1x8x128xf32> to vector<8x128xf32>
    %236 = vector.shape_cast %233 : vector<8x128xf32> to vector<1x8x128xf32>
    tpu.vector_store %arg5[%c6_66, %c0_67, %c0_68], %236 {strides = array<i32>} : memref<8x8x128xf32, #tpu.memory_space<vmem>>, vector<1x8x128xf32>,
    %c7 = arith.constant 7 : index
    %c0_69 = arith.constant 0 : index
    %c0_70 = arith.constant 0 : index
    %237 = vector.load %arg1[%c7, %c0_69, %c0_70] : memref<8x8x512xf32, #tpu.memory_space<vmem>>, vector<1x8x512xf32>
    %238 = vector.shape_cast %237 : vector<1x8x512xf32> to vector<8x512xf32>
    %239 = arith.truncf %233 : vector<8x128xf32> to vector<8x128xbf16>
    %cst_71 = arith.constant dense<0.000000e+00> : vector<8x512xf32>
    %240 = tpu.matmul %239, %3, %cst_71 {dimension_numbers = #tpu.dot_dimension_numbers<[1], [0], [0], [1], [0, 0, 1, 1], [], []>} : vector<8x128xbf16>, vector<128x512xbf16>, vector<8x512xf32> -> vector<8x512xf32>
    %241 = arith.addf %240, %238 : vector<8x512xf32>
    %242 = vector.extract_strided_slice %241 {offsets = [0, 0], sizes = [8, 128], strides = [1, 1]} : vector<8x512xf32> to vector<8x128xf32>
    %243 = arith.negf %242 : vector<8x128xf32>
    %244 = math.exp %243 : vector<8x128xf32>
    %cst_72 = arith.constant 1.000000e+00 : f32
    %245 = vector.broadcast %cst_72 : f32 to vector<8x128xf32>
    %246 = arith.addf %245, %244 : vector<8x128xf32>
    %247 = arith.divf %245, %246 : vector<8x128xf32>
    %248 = vector.extract_strided_slice %241 {offsets = [0, 128], sizes = [8, 128], strides = [1, 1]} : vector<8x512xf32> to vector<8x128xf32>
    %249 = arith.negf %248 : vector<8x128xf32>
    %250 = math.exp %249 : vector<8x128xf32>
    %cst_73 = arith.constant 1.000000e+00 : f32
    %251 = vector.broadcast %cst_73 : f32 to vector<8x128xf32>
    %252 = arith.addf %251, %250 : vector<8x128xf32>
    %253 = arith.divf %251, %252 : vector<8x128xf32>
    %254 = vector.extract_strided_slice %241 {offsets = [0, 256], sizes = [8, 128], strides = [1, 1]} : vector<8x512xf32> to vector<8x128xf32>
    %255 = math.tanh %254 : vector<8x128xf32>
    %256 = vector.extract_strided_slice %241 {offsets = [0, 384], sizes = [8, 128], strides = [1, 1]} : vector<8x512xf32> to vector<8x128xf32>
    %257 = arith.negf %256 : vector<8x128xf32>
    %258 = math.exp %257 : vector<8x128xf32>
    %cst_74 = arith.constant 1.000000e+00 : f32
    %259 = vector.broadcast %cst_74 : f32 to vector<8x128xf32>
    %260 = arith.addf %259, %258 : vector<8x128xf32>
    %261 = arith.divf %259, %260 : vector<8x128xf32>
    %262 = arith.mulf %253, %231 : vector<8x128xf32>
    %263 = arith.mulf %247, %255 : vector<8x128xf32>
    %264 = arith.addf %262, %263 : vector<8x128xf32>
    %265 = math.tanh %264 : vector<8x128xf32>
    %266 = arith.mulf %261, %265 : vector<8x128xf32>
    %c7_75 = arith.constant 7 : index
    %c0_76 = arith.constant 0 : index
    %c0_77 = arith.constant 0 : index
    %267 = vector.load %arg5[%c7_75, %c0_76, %c0_77] : memref<8x8x128xf32, #tpu.memory_space<vmem>>, vector<1x8x128xf32>
    %268 = vector.shape_cast %267 : vector<1x8x128xf32> to vector<8x128xf32>
    %269 = vector.shape_cast %266 : vector<8x128xf32> to vector<1x8x128xf32>
    tpu.vector_store %arg5[%c7_75, %c0_76, %c0_77], %269 {strides = array<i32>} : memref<8x8x128xf32, #tpu.memory_space<vmem>>, vector<1x8x128xf32>,
    %c0_78 = arith.constant 0 : index
    %c0_79 = arith.constant 0 : index
    %270 = vector.load %arg6[%c0_78, %c0_79] : memref<8x128xf32, #tpu.memory_space<vmem>>, vector<8x128xf32>
    tpu.vector_store %arg6[%c0_78, %c0_79], %266 {strides = array<i32>} : memref<8x128xf32, #tpu.memory_space<vmem>>, vector<8x128xf32>,
    %c0_80 = arith.constant 0 : index
    %c0_81 = arith.constant 0 : index
    %271 = vector.load %arg7[%c0_80, %c0_81] : memref<8x128xf32, #tpu.memory_space<vmem>>, vector<8x128xf32>
    tpu.vector_store %arg7[%c0_80, %c0_81], %264 {strides = array<i32>} : memref<8x128xf32, #tpu.memory_space<vmem>>, vector<8x128xf32>,
    return
  }
  func.func @transform_0(%arg0: i32) -> (i32, i32, i32) {
    %c0_i32 = arith.constant 0 : i32
    %c0_i32_0 = arith.constant 0 : i32
    %c0_i32_1 = arith.constant 0 : i32
    return %arg0, %c0_i32, %c0_i32_0 : i32, i32, i32
  }
  func.func @transform_1(%arg0: i32) -> (i32, i32) {
    %c0_i32 = arith.constant 0 : i32
    %c0_i32_0 = arith.constant 0 : i32
    %c0_i32_1 = arith.constant 0 : i32
    return %c0_i32, %c0_i32_0 : i32, i32
  }
  func.func @transform_2(%arg0: i32) -> (i32, i32) {
    %c0_i32 = arith.constant 0 : i32
    %c0_i32_0 = arith.constant 0 : i32
    %c0_i32_1 = arith.constant 0 : i32
    return %c0_i32, %c0_i32_0 : i32, i32
  }
  func.func @transform_3(%arg0: i32) -> (i32, i32) {
    %c0_i32 = arith.constant 0 : i32
    %c0_i32_0 = arith.constant 0 : i32
    %c0_i32_1 = arith.constant 0 : i32
    return %c0_i32, %c0_i32_0 : i32, i32
  }
  func.func @transform_4(%arg0: i32) -> (i32, i32, i32) {
    %c0_i32 = arith.constant 0 : i32
    %c0_i32_0 = arith.constant 0 : i32
    %c0_i32_1 = arith.constant 0 : i32
    return %arg0, %c0_i32, %c0_i32_0 : i32, i32, i32
  }
  func.func @transform_5(%arg0: i32) -> (i32, i32) {
    %c0_i32 = arith.constant 0 : i32
    %c0_i32_0 = arith.constant 0 : i32
    %c0_i32_1 = arith.constant 0 : i32
    return %c0_i32, %c0_i32_0 : i32, i32
  }
  func.func @transform_6(%arg0: i32) -> (i32, i32) {
    %c0_i32 = arith.constant 0 : i32
    %c0_i32_0 = arith.constant 0 : i32
    %c0_i32_1 = arith.constant 0 : i32
    return %c0_i32, %c0_i32_0 : i32, i32
  }
}

</mosaic_0001>

<bundles_post_ra>
// kernel: tpu_custom_call.1
= control target key start
LH: loop header
LB: loop body
LE: loop exit
PB: predicated region body
PF: predicated region fallthrough
CT: control target
= control target key end

     0   :  { %12 = vsyncpa [#allocation3], 0  ;;  %s2103_s0 = inlined_call_operand.hbm [shape: f32[8,8,512], index: 0, kind: input, shape index: {}]   ;;  %s2104_s1 = inlined_call_operand.hbm [shape: bf16[128,512], index: 1, kind: input, shape index: {}]   ;;  %s2105_s2 = inlined_call_operand.hbm [shape: f32[8,128], index: 2, kind: input, shape index: {}]   ;;  %s2106_s3 = inlined_call_operand.vmem [shape: f32[8,128], index: 3, kind: input, shape index: {}]   ;;  %s2107_s4 = inlined_call_operand.hbm [shape: f32[8,8,128], index: 4, kind: output, shape index: {0}]   ;;  %s2108_s5 = inlined_call_operand.hbm [shape: f32[8,128], index: 5, kind: output, shape index: {1}]   ;;  %s2109_s6 = inlined_call_operand.hbm [shape: f32[8,128], index: 6, kind: output, shape index: {2}]  }
   0x1   :  { %13 = vsyncpa [#allocation6], 0 }
   0x2   :  { %14 = vsyncpa [#allocation4], 0 }
   0x3   :  { %15 = vsyncpa [#allocation10], 0  ;;  %s1638_s21 = smov [#allocation5]   ;;  %s1498_s25 = scalar_lea.hbm %s2104_s1, 4096 }
   0x4   :  { %s33_s22 = sshll.u32 %s1638_s21, 4  ;;  %p1499_p0 = scmp.ne.s32.totalorder %s2104_s1, %s1498_s25  ;;  %s34_s22 = int_to_ptr.vmem [resolvable:$true] %s33_s22 }
   0x5   :  { %p1502_p1 = scmp.lt.u32.totalorder %s1498_s25, %s2104_s1 }
   0x7   :  { %p1504_p2 = pnand %p1502_p1, %p1499_p0 }
   0x9   :  { %1507 = shalt.err (!%p1504_p2)
}
   0xa   :  { %s1508_s30 = scalar_lea.vmem %s34_s22, 4096  ;;  %p1513_p4 = scmp.lt.s32.totalorder %s34_s22, %s34_s22 }
   0xb   :  { %p1509_p3 = scmp.ne.s32.totalorder %s34_s22, %s1508_s30  ;;  %p1514_p5 = scmp.lt.s32.totalorder %s1508_s30, %s1508_s30 }
   0xd   :  { %p1515_p6 = por %p1514_p5, %p1513_p4 }
   0xf   :  { %p1516_p7 = pnand %p1515_p6, %p1509_p3 }
  0x11   :  { %1519 = shalt.err (!%p1516_p7)
}
  0x12   :  { %s1639_s7 = smov 256   ;;  %s1640_s8 = smov 16  }
  0x13   :  { %39 = dma.hbm_to_vmem [thread:$0]  %s2104_s1, 4096, %s34_s22, [#allocation6], %s1639_s7, %s1639_s7, %s1640_s8  }
  0x14   :  { %s1641_s11 = smov [#allocation2]   ;;  %s1520_s15 = scalar_lea.hbm %s2103_s0, 4096 }
  0x15   :  { %s21_s12 = sshll.u32 %s1641_s11, 4  ;;  %p1521_p8 = scmp.ne.s32.totalorder %s2103_s0, %s1520_s15  ;;  %s22_s12 = int_to_ptr.vmem [resolvable:$true] %s21_s12 }
  0x16   :  { %p1524_p9 = scmp.lt.u32.totalorder %s1520_s15, %s2103_s0 }
  0x18   :  { %p1526_p10 = pnand %p1524_p9, %p1521_p8 }
  0x1a   :  { %1529 = shalt.err (!%p1526_p10)
}
  0x1b   :  { %s1530_s20 = scalar_lea.vmem %s22_s12, 4096  ;;  %p1535_p12 = scmp.lt.s32.totalorder %s22_s12, %s22_s12 }
  0x1c   :  { %p1531_p11 = scmp.ne.s32.totalorder %s22_s12, %s1530_s20  ;;  %p1536_p13 = scmp.lt.s32.totalorder %s1530_s20, %s1530_s20 }
  0x1e   :  { %p1537_p0 = por %p1536_p13, %p1535_p12 }
  0x20   :  { %p1538_p1 = pnand %p1537_p0, %p1531_p11 }
  0x22   :  { %1541 = shalt.err (!%p1538_p1)
}
  0x23   :  { %s1642_s1 = smov 512   ;;  %s1643_s21 = smov 32  }
  0x24   :  { %27 = dma.hbm_to_vmem [thread:$0]  %s2103_s0, 4096, %s22_s12, [#allocation3], %s1642_s1, %s1642_s1, %s1643_s21  }
  0x25   :  { %s1644_s24 = smov [#allocation7]   ;;  %s1542_s28 = scalar_lea.hbm %s2105_s2, 128 }
  0x26   :  { %s46_s25 = sshll.u32 %s1644_s24, 4  ;;  %p1543_p2 = scmp.ne.s32.totalorder %s2105_s2, %s1542_s28  ;;  %s47_s25 = int_to_ptr.vmem [resolvable:$true] %s46_s25 }
  0x27   :  { %p1546_p3 = scmp.lt.u32.totalorder %s1542_s28, %s2105_s2 }
  0x29   :  { %p1548_p4 = pnand %p1546_p3, %p1543_p2 }
  0x2b   :  { %1551 = shalt.err (!%p1548_p4)
}
  0x2c   :  { %s1552_s9 = scalar_lea.vmem %s47_s25, 128  ;;  %p1557_p6 = scmp.lt.s32.totalorder %s47_s25, %s47_s25 }
  0x2d   :  { %p1553_p5 = scmp.ne.s32.totalorder %s47_s25, %s1552_s9  ;;  %p1558_p7 = scmp.lt.s32.totalorder %s1552_s9, %s1552_s9 }
  0x2f   :  { %p1559_p8 = por %p1558_p7, %p1557_p6 }
  0x31   :  { %p1560_p9 = pnand %p1559_p8, %p1553_p5 }
  0x33   :  { %1563 = shalt.err (!%p1560_p9)
}
  0x34   :  { %49 = dma.hbm_to_vmem [thread:$0]  %s2105_s2, 128, %s47_s25, [#allocation6]  }
  0x35   :  { %1630 = dma.done.wait [#allocation3], 4096  }
  0x36   :  { %1631 = vsyncadd [#allocation3], 4294963200 }
  0x37   :  { %1632 = dma.done.wait [#allocation6], 4224  }
  0x38   :  { %1633 = vsyncadd [#allocation6], 4294963072  ;;  %v1645_v0 = vmov 0   ;;  %v1724_v1 = vld [vmem:[#allocation5 + $0x4] ss:$16 sps:$4 sm:$0xff]   ;;  %v105_v36 = vld [vmem:[#allocation2 + $0x8] sm:$0xff] }
  0x39   :  { %301 = vmatprep.mubr.bf16.mxu0 %v1645_v0  ;;  %342 = vmatprep.mubr.bf16.mxu1 %v1645_v0  ;;  %v1726_v2 = vld [vmem:[#allocation5] ss:$16 sps:$4 sm:$0xff]   ;;  %v1729_v3 = vld [vmem:[#allocation5 + $0x24] ss:$16 sps:$4 sm:$0xff]   ;;  %v1737_v6 = vld [vmem:[#allocation5 + $0xc] ss:$16 sps:$4 sm:$0xff]  }
  0x3a   :  { %269 = vmatprep.subr.bf16.mxu0 %v1724_v1  ;;  %v1732_v4 = vld [vmem:[#allocation5 + $0x20] ss:$16 sps:$4 sm:$0xff]   ;;  %v1735_v5 = vld [vmem:[#allocation5 + $0x44] ss:$16 sps:$4 sm:$0xff]   ;;  %v1739_v7 = vld [vmem:[#allocation5 + $0x8] ss:$16 sps:$4 sm:$0xff]   ;;  %310 = vmatprep.subr.bf16.mxu1 %v1737_v6 }
  0x3b   :  { %270 = vmatpush1.bf16.msra.mxu0 %v1726_v2  ;;  %v1742_v8 = vld [vmem:[#allocation5 + $0x40] ss:$16 sps:$4 sm:$0xff]   ;;  %v1746_v9 = vld [vmem:[#allocation5 + $0x64] ss:$16 sps:$4 sm:$0xff]   ;;  %311 = vmatpush1.bf16.msra.mxu1 %v1739_v7  ;;  %v1749_v10 = vld [vmem:[#allocation5 + $0x2c] ss:$16 sps:$4 sm:$0xff]  }
  0x3c   :  { %271 = vmatprep.subr.bf16.mxu0 %v1729_v3  ;;  %v1751_v11 = vld [vmem:[#allocation5 + $0x28] ss:$16 sps:$4 sm:$0xff]   ;;  %312 = vmatprep.subr.bf16.mxu1 %v1749_v10  ;;  %v1755_v12 = vld [vmem:[#allocation5 + $0x60] ss:$16 sps:$4 sm:$0xff]   ;;  %v1757_v13 = vld [vmem:[#allocation5 + $0x84] ss:$16 sps:$4 sm:$0xff]  }
  0x3d   :  { %v1759_v14 = vld [vmem:[#allocation5 + $0x4c] ss:$16 sps:$4 sm:$0xff]   ;;  %v1763_v15 = vld [vmem:[#allocation5 + $0x48] ss:$16 sps:$4 sm:$0xff]   ;;  %v1769_v17 = vld [vmem:[#allocation5 + $0x80] ss:$16 sps:$4 sm:$0xff]  }
  0x3e   :  { %v1766_v16 = vld [vmem:[#allocation5 + $0x6c] ss:$16 sps:$4 sm:$0xff]   ;;  %v1772_v18 = vld [vmem:[#allocation5 + $0xa4] ss:$16 sps:$4 sm:$0xff]   ;;  %v1775_v19 = vld [vmem:[#allocation5 + $0x68] ss:$16 sps:$4 sm:$0xff]  }
  0x3f   :  { %272 = vmatpush1.bf16.msra.mxu0 %v1732_v4  ;;  %313 = vmatpush1.bf16.msra.mxu1 %v1751_v11  ;;  %v1778_v20 = vld [vmem:[#allocation5 + $0x8c] ss:$16 sps:$4 sm:$0xff]   ;;  %v1780_v21 = vld [vmem:[#allocation5 + $0xa0] ss:$16 sps:$4 sm:$0xff]   ;;  %v1783_v22 = vld [vmem:[#allocation5 + $0xc4] ss:$16 sps:$4 sm:$0xff]  }
  0x40   :  { %273 = vmatprep.subr.bf16.mxu0 %v1735_v5  ;;  %314 = vmatprep.subr.bf16.mxu1 %v1759_v14  ;;  %v1787_v23 = vld [vmem:[#allocation5 + $0x88] ss:$16 sps:$4 sm:$0xff]   ;;  %v1790_v24 = vld [vmem:[#allocation5 + $0xac] ss:$16 sps:$4 sm:$0xff]   ;;  %v1793_v25 = vld [vmem:[#allocation5 + $0xc0] ss:$16 sps:$4 sm:$0xff]  }
  0x41   :  { %v1796_v26 = vld [vmem:[#allocation5 + $0xe4] ss:$16 sps:$4 sm:$0xff]   ;;  %v1799_v27 = vld [vmem:[#allocation5 + $0xa8] ss:$16 sps:$4 sm:$0xff]   ;;  %v1802_v28 = vld [vmem:[#allocation5 + $0xcc] ss:$16 sps:$4 sm:$0xff]  }
  0x42   :  { %v1805_v29 = vld [vmem:[#allocation5 + $0xe0] ss:$16 sps:$4 sm:$0xff]   ;;  %v1809_v31 = vld [vmem:[#allocation5 + $0xc8] ss:$16 sps:$4 sm:$0xff]   ;;  %v1812_v32 = vld [vmem:[#allocation5 + $0xec] ss:$16 sps:$4 sm:$0xff]  }
  0x43   :  { %274 = vmatpush1.bf16.msra.mxu0 %v1742_v8  ;;  %315 = vmatpush1.bf16.msra.mxu1 %v1763_v15  ;;  %v66_v30 = vld [vmem:[#allocation7] sm:$0xff]  ;;  %v1816_v34 = vld [vmem:[#allocation5 + $0xe8] ss:$16 sps:$4 sm:$0xff]   ;;  %v106_v51 = vld [vmem:[#allocation2 + $0x10] sm:$0xff]  ;;  %s1647_s13 = smov [#allocation8]   ;;  %s1648_s15 = smov [#allocation11]  }
  0x44   :  { %275 = vmatprep.subr.bf16.mxu0 %v1746_v9  ;;  %316 = vmatprep.subr.bf16.mxu1 %v1766_v16  ;;  %v108_v33 = vpack.c.bf16 %v66_v30, %v66_v30  ;;  %v104_v35 = vld [vmem:[#allocation2] sm:$0xff]  ;;  %v107_v45 = vld [vmem:[#allocation2 + $0x18] sm:$0xff]  ;;  %s1181_s14 = sshll.u32 %s1647_s13, 4  ;;  %s1204_s16 = sshll.u32 %s1648_s15, 4  ;;  %s2053_s14 = int_to_ptr.vmem [resolvable:$true] %s1181_s14  ;;  %s2055_s16 = int_to_ptr.vmem [resolvable:$true] %s1204_s16 }
  0x45   :  { %v68_v60 = vld [vmem:[%s2106_s3] sm:$0xff]  ;;  %s1646_s3 = smov [#allocation9]  }
  0x46   :  { %s1194_s12 = sshll.u32 %s1646_s3, 4  ;;  %s1195_s12 = int_to_ptr.vmem [resolvable:$true] %s1194_s12 }
  0x47   :  { %276 = vmatpush1.bf16.msra.mxu0 %v1755_v12  ;;  %317 = vmatpush1.bf16.msra.mxu1 %v1775_v19  ;;  %s1564_s17 = scalar_lea.vmem %s1195_s12, 128  ;;  %p1569_p11 = scmp.lt.s32.totalorder %s1195_s12, %s1195_s12 }
  0x48   :  { %277 = vmatprep.subr.bf16.mxu0 %v1757_v13  ;;  %318 = vmatprep.subr.bf16.mxu1 %v1778_v20  ;;  %p1565_p10 = scmp.ne.s32.totalorder %s1195_s12, %s1564_s17  ;;  %p1570_p12 = scmp.lt.s32.totalorder %s1564_s17, %s1564_s17 }
  0x4a   :  { %p1571_p13 = por %p1570_p12, %p1569_p11 }
  0x4b   :  { %278 = vmatpush1.bf16.msra.mxu0 %v1769_v17  ;;  %319 = vmatpush1.bf16.msra.mxu1 %v1787_v23 }
  0x4c   :  { %279 = vmatprep.subr.bf16.mxu0 %v1772_v18  ;;  %320 = vmatprep.subr.bf16.mxu1 %v1790_v24  ;;  %p1572_p0 = pnand %p1571_p13, %p1565_p10 }
  0x4f   :  { %280 = vmatpush1.bf16.msra.mxu0 %v1780_v21  ;;  %321 = vmatpush1.bf16.msra.mxu1 %v1799_v27 }
  0x50   :  { %281 = vmatprep.subr.bf16.mxu0 %v1783_v22  ;;  %322 = vmatprep.subr.bf16.mxu1 %v1802_v28 }
  0x53   :  { %282 = vmatpush1.bf16.msra.mxu0 %v1793_v25  ;;  %323 = vmatpush1.bf16.msra.mxu1 %v1809_v31 }
  0x54   :  { %283 = vmatprep.subr.bf16.mxu0 %v1796_v26  ;;  %324 = vmatprep.subr.bf16.mxu1 %v1812_v32 }
  0x57   :  { %284 = vmatpush1.bf16.msra.mxu0 %v1805_v29  ;;  %325 = vmatpush1.bf16.msra.mxu1 %v1816_v34 }
  0x58   :  { %382 = vmatprep.subr.bf16.mxu0 %v1724_v1  ;;  %423 = vmatprep.subr.bf16.mxu1 %v1737_v6 }
  0x5a   :  { %302 = vmatmul.mubr.bf16.vlgmr.msra.gmra.mrb[0].mxu0 %v108_v33  ;;  %343 = vmatmul.mubr.bf16.vlgmr.msra.gmra.mrb[0].mxu1 %v108_v33 }
  0x5b   :  { %383 = vmatpush1.bf16.msra.mxu0 %v1726_v2  ;;  %414 = vmatprep.mubr.bf16.mxu0 %v1645_v0 }
  0x5c   :  { %384 = vmatprep.subr.bf16.mxu0 %v1729_v3  ;;  %424 = vmatpush1.bf16.msra.mxu1 %v1739_v7 }
  0x5d   :  { %425 = vmatprep.subr.bf16.mxu1 %v1749_v10  ;;  %455 = vmatprep.mubr.bf16.mxu1 %v1645_v0 }
  0x5f   :  { %385 = vmatpush1.bf16.msra.mxu0 %v1732_v4 }
  0x60   :  { %386 = vmatprep.subr.bf16.mxu0 %v1735_v5  ;;  %426 = vmatpush1.bf16.msra.mxu1 %v1751_v11 }
  0x61   :  { %427 = vmatprep.subr.bf16.mxu1 %v1759_v14 }
  0x63   :  { %387 = vmatpush1.bf16.msra.mxu0 %v1742_v8 }
  0x64   :  { %388 = vmatprep.subr.bf16.mxu0 %v1746_v9  ;;  %428 = vmatpush1.bf16.msra.mxu1 %v1763_v15 }
  0x65   :  { %429 = vmatprep.subr.bf16.mxu1 %v1766_v16 }
  0x67   :  { %389 = vmatpush1.bf16.msra.mxu0 %v1755_v12 }
  0x68   :  { %390 = vmatprep.subr.bf16.mxu0 %v1757_v13  ;;  %430 = vmatpush1.bf16.msra.mxu1 %v1775_v19 }
  0x69   :  { %431 = vmatprep.subr.bf16.mxu1 %v1778_v20 }
  0x6b   :  { %391 = vmatpush1.bf16.msra.mxu0 %v1769_v17 }
  0x6c   :  { %392 = vmatprep.subr.bf16.mxu0 %v1772_v18  ;;  %432 = vmatpush1.bf16.msra.mxu1 %v1787_v23 }
  0x6d   :  { %433 = vmatprep.subr.bf16.mxu1 %v1790_v24 }
  0x6f   :  { %393 = vmatpush1.bf16.msra.mxu0 %v1780_v21 }
  0x70   :  { %394 = vmatprep.subr.bf16.mxu0 %v1783_v22  ;;  %434 = vmatpush1.bf16.msra.mxu1 %v1799_v27 }
  0x71   :  { %435 = vmatprep.subr.bf16.mxu1 %v1802_v28 }
  0x73   :  { %395 = vmatpush1.bf16.msra.mxu0 %v1793_v25 }
  0x74   :  { %396 = vmatprep.subr.bf16.mxu0 %v1796_v26  ;;  %436 = vmatpush1.bf16.msra.mxu1 %v1809_v31 }
  0x75   :  { %437 = vmatprep.subr.bf16.mxu1 %v1812_v32 }
  0x77   :  { %397 = vmatpush1.bf16.msra.mxu0 %v1805_v29 }
  0x78   :  { %496 = vmatprep.subr.bf16.mxu0 %v1724_v1  ;;  %438 = vmatpush1.bf16.msra.mxu1 %v1816_v34 }
  0x79   :  { %537 = vmatprep.subr.bf16.mxu1 %v1737_v6 }
 0x12d   :  { %v303_v37 = vpop.f32.mrb[0].mxu0  ;;  %v344_v46 = vpop.f32.mrb[0].mxu1 }
 0x12e   :  { %v304_v38 = vadd.f32 %v303_v37, %v104_v35  ;;  %v305_v39 = vpop.f32.mrb[1].mxu0  ;;  %v346_v47 = vpop.f32.mrb[1].mxu1  ;;  %v345_v53 = vadd.f32 %v344_v46, %v106_v51 }
 0x12f   :  { %v306_v40 = vadd.f32 %v305_v39, %v105_v36  ;;  %v307_v41 = vpop.f32.mrb[2].mxu0  ;;  %v347_v48 = vadd.f32 %v346_v47, %v107_v45  ;;  %v348_v49 = vpop.f32.mrb[2].mxu1 }
 0x130   :  { %v1253_v42 = vmul.f32 -1.442695, %v304_v38  ;;  %v308_v43 = vpop.f32.mrb[3].mxu0  ;;  %v349_v50 = vpop.f32.mrb[3].mxu1  ;;  %v378_v41 = vld [vmem:[#allocation2 + $0x28] sm:$0xff] }
 0x131   :  { %v1254_v44 = vmul.f32 -1.442695, %v306_v40  ;;  %v1255_v52 = vmul.f32 -1.442695, %v347_v48  ;;  %v377_v40 = vld [vmem:[#allocation2 + $0x20] sm:$0xff] }
 0x132   :  { %1338 = vpow2.f32 %v1253_v42 }
 0x133   :  { %1340 = vpow2.f32 %v1254_v44 }
 0x134   :  { %1342 = vpow2.f32 %v1255_v52 }
 0x135   :  { %1344 = vtanh.f32 %v345_v53 }
 0x13c   :  { %v1339_v54 = vpop.eup %1338 }
 0x13d   :  { %v1341_v55 = vpop.eup %1340  ;;  %v354_v56 = vadd.f32 1.0, %v1339_v54  ;;  %v380_v54 = vld [vmem:[#allocation2 + $0x38] sm:$0xff] }
 0x13e   :  { %v360_v57 = vadd.f32 1.0, %v1341_v55  ;;  %v1343_v58 = vpop.eup %1342 }
 0x13f   :  { %1346 = vrcp.f32 %v354_v56  ;;  %v1345_v59 = vpop.eup %1344  ;;  %v367_v62 = vadd.f32 1.0, %v1343_v58  ;;  %v379_v56 = vld [vmem:[#allocation2 + $0x30] sm:$0xff] }
 0x140   :  { %1348 = vrcp.f32 %v360_v57 }
 0x141   :  { %1350 = vrcp.f32 %v367_v62 }
 0x149   :  { %v1347_v61 = vpop.eup %1346 }
 0x14a   :  { %v1349_v63 = vpop.eup %1348  ;;  %v371_v30 = vmul.f32 %v1347_v61, %v1345_v59 }
 0x14b   :  { %v370_v33 = vmul.f32 %v1349_v63, %v68_v60  ;;  %v1351_v36 = vpop.eup %1350 }
 0x14d   :  { %v1859_v35 = vadd.f32 %v371_v30, %v370_v33 }
 0x14f   :  { %1352 = vtanh.f32 %v1859_v35 }
 0x159   :  { %v1353_v37 = vpop.eup %1352 }
 0x15a   :  { %v374_v38 = vmul.f32 %v1353_v37, %v1351_v36 }
 0x15c   :  { %375 = vst [vmem:[#allocation8] sm:$0xff] %v374_v38  ;;  %v381_v39 = vpack.c.bf16 %v374_v38, %v374_v38 }
 0x15e   :  { %415 = vmatmul.mubr.bf16.vlgmr.msra.gmra.mrb[4].mxu0 %v381_v39  ;;  %456 = vmatmul.mubr.bf16.vlgmr.msra.gmra.mrb[4].mxu1 %v381_v39 }
 0x15f   :  { %497 = vmatpush1.bf16.msra.mxu0 %v1726_v2  ;;  %538 = vmatpush1.bf16.msra.mxu1 %v1739_v7 }
 0x160   :  { %498 = vmatprep.subr.bf16.mxu0 %v1729_v3  ;;  %539 = vmatprep.subr.bf16.mxu1 %v1749_v10 }
 0x161   :  { %528 = vmatprep.mubr.bf16.mxu0 %v1645_v0  ;;  %569 = vmatprep.mubr.bf16.mxu1 %v1645_v0 }
 0x163   :  { %499 = vmatpush1.bf16.msra.mxu0 %v1732_v4  ;;  %540 = vmatpush1.bf16.msra.mxu1 %v1751_v11 }
 0x164   :  { %500 = vmatprep.subr.bf16.mxu0 %v1735_v5  ;;  %541 = vmatprep.subr.bf16.mxu1 %v1759_v14 }
 0x167   :  { %501 = vmatpush1.bf16.msra.mxu0 %v1742_v8  ;;  %542 = vmatpush1.bf16.msra.mxu1 %v1763_v15 }
 0x168   :  { %502 = vmatprep.subr.bf16.mxu0 %v1746_v9  ;;  %543 = vmatprep.subr.bf16.mxu1 %v1766_v16 }
 0x16b   :  { %503 = vmatpush1.bf16.msra.mxu0 %v1755_v12  ;;  %544 = vmatpush1.bf16.msra.mxu1 %v1775_v19 }
 0x16c   :  { %504 = vmatprep.subr.bf16.mxu0 %v1757_v13  ;;  %545 = vmatprep.subr.bf16.mxu1 %v1778_v20 }
 0x16f   :  { %505 = vmatpush1.bf16.msra.mxu0 %v1769_v17  ;;  %546 = vmatpush1.bf16.msra.mxu1 %v1787_v23 }
 0x170   :  { %506 = vmatprep.subr.bf16.mxu0 %v1772_v18  ;;  %547 = vmatprep.subr.bf16.mxu1 %v1790_v24 }
 0x173   :  { %507 = vmatpush1.bf16.msra.mxu0 %v1780_v21  ;;  %548 = vmatpush1.bf16.msra.mxu1 %v1799_v27 }
 0x174   :  { %508 = vmatprep.subr.bf16.mxu0 %v1783_v22  ;;  %549 = vmatprep.subr.bf16.mxu1 %v1802_v28 }
 0x177   :  { %509 = vmatpush1.bf16.msra.mxu0 %v1793_v25  ;;  %550 = vmatpush1.bf16.msra.mxu1 %v1809_v31 }
 0x178   :  { %510 = vmatprep.subr.bf16.mxu0 %v1796_v26  ;;  %551 = vmatprep.subr.bf16.mxu1 %v1812_v32 }
 0x17b   :  { %511 = vmatpush1.bf16.msra.mxu0 %v1805_v29  ;;  %552 = vmatpush1.bf16.msra.mxu1 %v1816_v34 }
 0x17c   :  { %610 = vmatprep.subr.bf16.mxu0 %v1724_v1  ;;  %651 = vmatprep.subr.bf16.mxu1 %v1737_v6 }
 0x231   :  { %v416_v42 = vpop.f32.mrb[4].mxu0  ;;  %v457_v43 = vpop.f32.mrb[4].mxu1 }
 0x232   :  { %v417_v44 = vadd.f32 %v416_v42, %v377_v40  ;;  %v418_v45 = vpop.f32.mrb[5].mxu0  ;;  %v459_v46 = vpop.f32.mrb[5].mxu1  ;;  %v458_v58 = vadd.f32 %v457_v43, %v379_v56 }
 0x233   :  { %v419_v47 = vadd.f32 %v418_v45, %v378_v41  ;;  %v420_v48 = vpop.f32.mrb[6].mxu0  ;;  %v461_v49 = vpop.f32.mrb[6].mxu1  ;;  %v460_v55 = vadd.f32 %v459_v46, %v380_v54  ;;  %v492_v45 = vld [vmem:[#allocation2 + $0x48] sm:$0xff] }
 0x234   :  { %v1256_v50 = vmul.f32 -1.442695, %v417_v44  ;;  %v421_v51 = vpop.f32.mrb[7].mxu0  ;;  %v462_v52 = vpop.f32.mrb[7].mxu1 }
 0x235   :  { %v1257_v53 = vmul.f32 -1.442695, %v419_v47  ;;  %v1258_v57 = vmul.f32 -1.442695, %v460_v55 }
 0x236   :  { %1354 = vpow2.f32 %v1256_v50 }
 0x237   :  { %1356 = vpow2.f32 %v1257_v53 }
 0x238   :  { %1358 = vpow2.f32 %v1258_v57 }
 0x239   :  { %1360 = vtanh.f32 %v458_v58  ;;  %v494_v58 = vld [vmem:[#allocation2 + $0x58] sm:$0xff] }
 0x240   :  { %v1355_v59 = vpop.eup %1354 }
 0x241   :  { %v1357_v60 = vpop.eup %1356  ;;  %v467_v61 = vadd.f32 1.0, %v1355_v59 }
 0x242   :  { %v473_v62 = vadd.f32 1.0, %v1357_v60  ;;  %v1359_v63 = vpop.eup %1358  ;;  %v493_v60 = vld [vmem:[#allocation2 + $0x50] sm:$0xff] }
 0x243   :  { %1362 = vrcp.f32 %v467_v61  ;;  %v1361_v30 = vpop.eup %1360  ;;  %v480_v38 = vadd.f32 1.0, %v1359_v63 }
 0x244   :  { %1364 = vrcp.f32 %v473_v62 }
 0x245   :  { %1366 = vrcp.f32 %v480_v38 }
 0x24d   :  { %v1363_v33 = vpop.eup %1362 }
 0x24e   :  { %v1365_v36 = vpop.eup %1364  ;;  %v484_v37 = vmul.f32 %v1363_v33, %v1361_v30 }
 0x24f   :  { %v483_v39 = vmul.f32 %v1365_v36, %v1859_v35  ;;  %v1367_v41 = vpop.eup %1366  ;;  %v491_v35 = vld [vmem:[#allocation2 + $0x40] sm:$0xff] }
 0x251   :  { %v1897_v40 = vadd.f32 %v484_v37, %v483_v39 }
 0x253   :  { %1368 = vtanh.f32 %v1897_v40 }
 0x25d   :  { %v1369_v42 = vpop.eup %1368 }
 0x25e   :  { %v487_v43 = vmul.f32 %v1369_v42, %v1367_v41 }
 0x260   :  { %489 = vst [vmem:[#allocation8 + $0x8] sm:$0xff] %v487_v43  ;;  %v495_v44 = vpack.c.bf16 %v487_v43, %v487_v43 }
 0x262   :  { %529 = vmatmul.mubr.bf16.vlgmr.msra.gmra.mrb[8].mxu0 %v495_v44  ;;  %570 = vmatmul.mubr.bf16.vlgmr.msra.gmra.mrb[8].mxu1 %v495_v44 }
 0x263   :  { %611 = vmatpush1.bf16.msra.mxu0 %v1726_v2  ;;  %652 = vmatpush1.bf16.msra.mxu1 %v1739_v7 }
 0x264   :  { %612 = vmatprep.subr.bf16.mxu0 %v1729_v3  ;;  %653 = vmatprep.subr.bf16.mxu1 %v1749_v10 }
 0x265   :  { %642 = vmatprep.mubr.bf16.mxu0 %v1645_v0  ;;  %683 = vmatprep.mubr.bf16.mxu1 %v1645_v0 }
 0x267   :  { %613 = vmatpush1.bf16.msra.mxu0 %v1732_v4  ;;  %654 = vmatpush1.bf16.msra.mxu1 %v1751_v11 }
 0x268   :  { %614 = vmatprep.subr.bf16.mxu0 %v1735_v5  ;;  %655 = vmatprep.subr.bf16.mxu1 %v1759_v14 }
 0x26b   :  { %615 = vmatpush1.bf16.msra.mxu0 %v1742_v8  ;;  %656 = vmatpush1.bf16.msra.mxu1 %v1763_v15 }
 0x26c   :  { %616 = vmatprep.subr.bf16.mxu0 %v1746_v9  ;;  %657 = vmatprep.subr.bf16.mxu1 %v1766_v16 }
 0x26f   :  { %617 = vmatpush1.bf16.msra.mxu0 %v1755_v12  ;;  %658 = vmatpush1.bf16.msra.mxu1 %v1775_v19 }
 0x270   :  { %618 = vmatprep.subr.bf16.mxu0 %v1757_v13  ;;  %659 = vmatprep.subr.bf16.mxu1 %v1778_v20 }
 0x273   :  { %619 = vmatpush1.bf16.msra.mxu0 %v1769_v17  ;;  %660 = vmatpush1.bf16.msra.mxu1 %v1787_v23 }
 0x274   :  { %620 = vmatprep.subr.bf16.mxu0 %v1772_v18  ;;  %661 = vmatprep.subr.bf16.mxu1 %v1790_v24 }
 0x277   :  { %621 = vmatpush1.bf16.msra.mxu0 %v1780_v21  ;;  %662 = vmatpush1.bf16.msra.mxu1 %v1799_v27 }
 0x278   :  { %622 = vmatprep.subr.bf16.mxu0 %v1783_v22  ;;  %663 = vmatprep.subr.bf16.mxu1 %v1802_v28 }
 0x27b   :  { %623 = vmatpush1.bf16.msra.mxu0 %v1793_v25  ;;  %664 = vmatpush1.bf16.msra.mxu1 %v1809_v31 }
 0x27c   :  { %624 = vmatprep.subr.bf16.mxu0 %v1796_v26  ;;  %665 = vmatprep.subr.bf16.mxu1 %v1812_v32 }
 0x27f   :  { %625 = vmatpush1.bf16.msra.mxu0 %v1805_v29  ;;  %666 = vmatpush1.bf16.msra.mxu1 %v1816_v34 }
 0x280   :  { %724 = vmatprep.subr.bf16.mxu0 %v1724_v1  ;;  %765 = vmatprep.subr.bf16.mxu1 %v1737_v6 }
 0x335   :  { %v530_v46 = vpop.f32.mrb[8].mxu0  ;;  %v571_v47 = vpop.f32.mrb[8].mxu1 }
 0x336   :  { %v531_v48 = vadd.f32 %v530_v46, %v491_v35  ;;  %v532_v49 = vpop.f32.mrb[9].mxu0  ;;  %v573_v50 = vpop.f32.mrb[9].mxu1  ;;  %v572_v62 = vadd.f32 %v571_v47, %v493_v60 }
 0x337   :  { %v533_v51 = vadd.f32 %v532_v49, %v492_v45  ;;  %v534_v52 = vpop.f32.mrb[10].mxu0  ;;  %v575_v53 = vpop.f32.mrb[10].mxu1  ;;  %v574_v59 = vadd.f32 %v573_v50, %v494_v58  ;;  %v606_v49 = vld [vmem:[#allocation2 + $0x68] sm:$0xff] }
 0x338   :  { %v1259_v54 = vmul.f32 -1.442695, %v531_v48  ;;  %v535_v55 = vpop.f32.mrb[11].mxu0  ;;  %v576_v56 = vpop.f32.mrb[11].mxu1 }
 0x339   :  { %v1260_v57 = vmul.f32 -1.442695, %v533_v51  ;;  %v1261_v61 = vmul.f32 -1.442695, %v574_v59 }
 0x33a   :  { %1370 = vpow2.f32 %v1259_v54 }
 0x33b   :  { %1372 = vpow2.f32 %v1260_v57 }
 0x33c   :  { %1374 = vpow2.f32 %v1261_v61 }
 0x33d   :  { %1376 = vtanh.f32 %v572_v62  ;;  %v608_v62 = vld [vmem:[#allocation2 + $0x78] sm:$0xff] }
 0x344   :  { %v1371_v63 = vpop.eup %1370 }
 0x345   :  { %v1373_v30 = vpop.eup %1372  ;;  %v581_v33 = vadd.f32 1.0, %v1371_v63 }
 0x346   :  { %v587_v36 = vadd.f32 1.0, %v1373_v30  ;;  %v1375_v37 = vpop.eup %1374  ;;  %v607_v30 = vld [vmem:[#allocation2 + $0x70] sm:$0xff] }
 0x347   :  { %1378 = vrcp.f32 %v581_v33  ;;  %v1377_v38 = vpop.eup %1376  ;;  %v594_v43 = vadd.f32 1.0, %v1375_v37 }
 0x348   :  { %1380 = vrcp.f32 %v587_v36 }
 0x349   :  { %1382 = vrcp.f32 %v594_v43 }
 0x351   :  { %v1379_v39 = vpop.eup %1378 }
 0x352   :  { %v1381_v41 = vpop.eup %1380  ;;  %v598_v42 = vmul.f32 %v1379_v39, %v1377_v38 }
 0x353   :  { %v597_v44 = vmul.f32 %v1381_v41, %v1897_v40  ;;  %v1383_v45 = vpop.eup %1382  ;;  %v605_v40 = vld [vmem:[#allocation2 + $0x60] sm:$0xff] }
 0x355   :  { %v1935_v35 = vadd.f32 %v598_v42, %v597_v44 }
 0x357   :  { %1384 = vtanh.f32 %v1935_v35 }
 0x361   :  { %v1385_v46 = vpop.eup %1384 }
 0x362   :  { %v601_v47 = vmul.f32 %v1385_v46, %v1383_v45 }
 0x364   :  { %603 = vst [vmem:[#allocation8 + $0x10] sm:$0xff] %v601_v47  ;;  %v609_v48 = vpack.c.bf16 %v601_v47, %v601_v47 }
 0x366   :  { %643 = vmatmul.mubr.bf16.vlgmr.msra.gmra.mrb[12].mxu0 %v609_v48  ;;  %684 = vmatmul.mubr.bf16.vlgmr.msra.gmra.mrb[12].mxu1 %v609_v48 }
 0x367   :  { %725 = vmatpush1.bf16.msra.mxu0 %v1726_v2  ;;  %766 = vmatpush1.bf16.msra.mxu1 %v1739_v7 }
 0x368   :  { %726 = vmatprep.subr.bf16.mxu0 %v1729_v3  ;;  %767 = vmatprep.subr.bf16.mxu1 %v1749_v10 }
 0x369   :  { %756 = vmatprep.mubr.bf16.mxu0 %v1645_v0  ;;  %797 = vmatprep.mubr.bf16.mxu1 %v1645_v0 }
 0x36b   :  { %727 = vmatpush1.bf16.msra.mxu0 %v1732_v4  ;;  %768 = vmatpush1.bf16.msra.mxu1 %v1751_v11 }
 0x36c   :  { %728 = vmatprep.subr.bf16.mxu0 %v1735_v5  ;;  %769 = vmatprep.subr.bf16.mxu1 %v1759_v14 }
 0x36f   :  { %729 = vmatpush1.bf16.msra.mxu0 %v1742_v8  ;;  %770 = vmatpush1.bf16.msra.mxu1 %v1763_v15 }
 0x370   :  { %730 = vmatprep.subr.bf16.mxu0 %v1746_v9  ;;  %771 = vmatprep.subr.bf16.mxu1 %v1766_v16 }
 0x373   :  { %731 = vmatpush1.bf16.msra.mxu0 %v1755_v12  ;;  %772 = vmatpush1.bf16.msra.mxu1 %v1775_v19 }
 0x374   :  { %732 = vmatprep.subr.bf16.mxu0 %v1757_v13  ;;  %773 = vmatprep.subr.bf16.mxu1 %v1778_v20 }
 0x377   :  { %733 = vmatpush1.bf16.msra.mxu0 %v1769_v17  ;;  %774 = vmatpush1.bf16.msra.mxu1 %v1787_v23 }
 0x378   :  { %734 = vmatprep.subr.bf16.mxu0 %v1772_v18  ;;  %775 = vmatprep.subr.bf16.mxu1 %v1790_v24 }
 0x37b   :  { %735 = vmatpush1.bf16.msra.mxu0 %v1780_v21  ;;  %776 = vmatpush1.bf16.msra.mxu1 %v1799_v27 }
 0x37c   :  { %736 = vmatprep.subr.bf16.mxu0 %v1783_v22  ;;  %777 = vmatprep.subr.bf16.mxu1 %v1802_v28 }
 0x37f   :  { %737 = vmatpush1.bf16.msra.mxu0 %v1793_v25  ;;  %778 = vmatpush1.bf16.msra.mxu1 %v1809_v31 }
 0x380   :  { %738 = vmatprep.subr.bf16.mxu0 %v1796_v26  ;;  %779 = vmatprep.subr.bf16.mxu1 %v1812_v32 }
 0x383   :  { %739 = vmatpush1.bf16.msra.mxu0 %v1805_v29  ;;  %780 = vmatpush1.bf16.msra.mxu1 %v1816_v34 }
 0x384   :  { %838 = vmatprep.subr.bf16.mxu0 %v1724_v1  ;;  %879 = vmatprep.subr.bf16.mxu1 %v1737_v6 }
 0x439   :  { %v644_v50 = vpop.f32.mrb[12].mxu0  ;;  %v685_v51 = vpop.f32.mrb[12].mxu1 }
 0x43a   :  { %v645_v52 = vadd.f32 %v644_v50, %v605_v40  ;;  %v646_v53 = vpop.f32.mrb[13].mxu0  ;;  %v687_v54 = vpop.f32.mrb[13].mxu1  ;;  %v686_v36 = vadd.f32 %v685_v51, %v607_v30 }
 0x43b   :  { %v647_v55 = vadd.f32 %v646_v53, %v606_v49  ;;  %v648_v56 = vpop.f32.mrb[14].mxu0  ;;  %v689_v57 = vpop.f32.mrb[14].mxu1  ;;  %v688_v63 = vadd.f32 %v687_v54, %v608_v62  ;;  %v720_v53 = vld [vmem:[#allocation2 + $0x88] sm:$0xff] }
 0x43c   :  { %v1262_v58 = vmul.f32 -1.442695, %v645_v52  ;;  %v649_v59 = vpop.f32.mrb[15].mxu0  ;;  %v690_v60 = vpop.f32.mrb[15].mxu1 }
 0x43d   :  { %v1263_v61 = vmul.f32 -1.442695, %v647_v55  ;;  %v1264_v33 = vmul.f32 -1.442695, %v688_v63 }
 0x43e   :  { %1386 = vpow2.f32 %v1262_v58 }
 0x43f   :  { %1388 = vpow2.f32 %v1263_v61 }
 0x440   :  { %1390 = vpow2.f32 %v1264_v33 }
 0x441   :  { %1392 = vtanh.f32 %v686_v36  ;;  %v722_v36 = vld [vmem:[#allocation2 + $0x98] sm:$0xff] }
 0x448   :  { %v1387_v37 = vpop.eup %1386 }
 0x449   :  { %v1389_v38 = vpop.eup %1388  ;;  %v695_v39 = vadd.f32 1.0, %v1387_v37  ;;  %v721_v37 = vld [vmem:[#allocation2 + $0x90] sm:$0xff] }
 0x44a   :  { %v701_v41 = vadd.f32 1.0, %v1389_v38  ;;  %v1391_v42 = vpop.eup %1390 }
 0x44b   :  { %1394 = vrcp.f32 %v695_v39  ;;  %v1393_v43 = vpop.eup %1392  ;;  %v708_v47 = vadd.f32 1.0, %v1391_v42 }
 0x44c   :  { %1396 = vrcp.f32 %v701_v41 }
 0x44d   :  { %1398 = vrcp.f32 %v708_v47 }
 0x455   :  { %v1395_v44 = vpop.eup %1394 }
 0x456   :  { %v1397_v45 = vpop.eup %1396  ;;  %v712_v46 = vmul.f32 %v1395_v44, %v1393_v43 }
 0x457   :  { %v711_v48 = vmul.f32 %v1397_v45, %v1935_v35  ;;  %v1399_v49 = vpop.eup %1398  ;;  %v719_v35 = vld [vmem:[#allocation2 + $0x80] sm:$0xff] }
 0x459   :  { %v1973_v40 = vadd.f32 %v712_v46, %v711_v48 }
 0x45b   :  { %1400 = vtanh.f32 %v1973_v40 }
 0x465   :  { %v1401_v50 = vpop.eup %1400 }
 0x466   :  { %v715_v51 = vmul.f32 %v1401_v50, %v1399_v49 }
 0x468   :  { %717 = vst [vmem:[#allocation8 + $0x18] sm:$0xff] %v715_v51  ;;  %v723_v52 = vpack.c.bf16 %v715_v51, %v715_v51 }
 0x46a   :  { %757 = vmatmul.mubr.bf16.vlgmr.msra.gmra.mrb[16].mxu0 %v723_v52  ;;  %798 = vmatmul.mubr.bf16.vlgmr.msra.gmra.mrb[16].mxu1 %v723_v52 }
 0x46b   :  { %839 = vmatpush1.bf16.msra.mxu0 %v1726_v2  ;;  %880 = vmatpush1.bf16.msra.mxu1 %v1739_v7 }
 0x46c   :  { %840 = vmatprep.subr.bf16.mxu0 %v1729_v3  ;;  %881 = vmatprep.subr.bf16.mxu1 %v1749_v10 }
 0x46d   :  { %870 = vmatprep.mubr.bf16.mxu0 %v1645_v0  ;;  %911 = vmatprep.mubr.bf16.mxu1 %v1645_v0 }
 0x46f   :  { %841 = vmatpush1.bf16.msra.mxu0 %v1732_v4  ;;  %882 = vmatpush1.bf16.msra.mxu1 %v1751_v11 }
 0x470   :  { %842 = vmatprep.subr.bf16.mxu0 %v1735_v5  ;;  %883 = vmatprep.subr.bf16.mxu1 %v1759_v14 }
 0x473   :  { %843 = vmatpush1.bf16.msra.mxu0 %v1742_v8  ;;  %884 = vmatpush1.bf16.msra.mxu1 %v1763_v15 }
 0x474   :  { %844 = vmatprep.subr.bf16.mxu0 %v1746_v9  ;;  %885 = vmatprep.subr.bf16.mxu1 %v1766_v16 }
 0x477   :  { %845 = vmatpush1.bf16.msra.mxu0 %v1755_v12  ;;  %886 = vmatpush1.bf16.msra.mxu1 %v1775_v19 }
 0x478   :  { %846 = vmatprep.subr.bf16.mxu0 %v1757_v13  ;;  %887 = vmatprep.subr.bf16.mxu1 %v1778_v20 }
 0x47b   :  { %847 = vmatpush1.bf16.msra.mxu0 %v1769_v17  ;;  %888 = vmatpush1.bf16.msra.mxu1 %v1787_v23 }
 0x47c   :  { %848 = vmatprep.subr.bf16.mxu0 %v1772_v18  ;;  %889 = vmatprep.subr.bf16.mxu1 %v1790_v24 }
 0x47f   :  { %849 = vmatpush1.bf16.msra.mxu0 %v1780_v21  ;;  %890 = vmatpush1.bf16.msra.mxu1 %v1799_v27 }
 0x480   :  { %850 = vmatprep.subr.bf16.mxu0 %v1783_v22  ;;  %891 = vmatprep.subr.bf16.mxu1 %v1802_v28 }
 0x483   :  { %851 = vmatpush1.bf16.msra.mxu0 %v1793_v25  ;;  %892 = vmatpush1.bf16.msra.mxu1 %v1809_v31 }
 0x484   :  { %852 = vmatprep.subr.bf16.mxu0 %v1796_v26  ;;  %893 = vmatprep.subr.bf16.mxu1 %v1812_v32 }
 0x487   :  { %853 = vmatpush1.bf16.msra.mxu0 %v1805_v29  ;;  %894 = vmatpush1.bf16.msra.mxu1 %v1816_v34 }
 0x488   :  { %952 = vmatprep.subr.bf16.mxu0 %v1724_v1  ;;  %993 = vmatprep.subr.bf16.mxu1 %v1737_v6 }
 0x53d   :  { %v758_v54 = vpop.f32.mrb[16].mxu0  ;;  %v799_v55 = vpop.f32.mrb[16].mxu1 }
 0x53e   :  { %v759_v56 = vadd.f32 %v758_v54, %v719_v35  ;;  %v760_v57 = vpop.f32.mrb[17].mxu0  ;;  %v801_v58 = vpop.f32.mrb[17].mxu1  ;;  %v800_v38 = vadd.f32 %v799_v55, %v721_v37  ;;  %v1475_v37 = vld [vmem:[#allocation5 + $0x4c] ss:$16 sps:$4 sm:$0xff]  }
 0x53f   :  { %v761_v59 = vadd.f32 %v760_v57, %v720_v53  ;;  %v762_v60 = vpop.f32.mrb[18].mxu0  ;;  %v803_v61 = vpop.f32.mrb[18].mxu1  ;;  %v802_v1 = vadd.f32 %v801_v58, %v722_v36  ;;  %v1473_v36 = vld [vmem:[#allocation5 + $0x28] ss:$16 sps:$4 sm:$0xff]  }
 0x540   :  { %v1265_v62 = vmul.f32 -1.442695, %v759_v56  ;;  %v763_v63 = vpop.f32.mrb[19].mxu0  ;;  %v804_v30 = vpop.f32.mrb[19].mxu1  ;;  %v1468_v61 = vld [vmem:[#allocation5] ss:$16 sps:$4 sm:$0xff]  }
 0x541   :  { %v1266_v33 = vmul.f32 -1.442695, %v761_v59  ;;  %v1267_v6 = vmul.f32 -1.442695, %v802_v1  ;;  %v1470_v63 = vld [vmem:[#allocation5 + $0x24] ss:$16 sps:$4 sm:$0xff]  }
 0x542   :  { %1402 = vpow2.f32 %v1265_v62  ;;  %v1469_v62 = vld [vmem:[#allocation5 + $0x8] ss:$16 sps:$4 sm:$0xff]   ;;  %v1471_v30 = vld [vmem:[#allocation5 + $0x2c] ss:$16 sps:$4 sm:$0xff]   ;;  %v1474_v1 = vld [vmem:[#allocation5 + $0x44] ss:$16 sps:$4 sm:$0xff]  }
 0x543   :  { %1404 = vpow2.f32 %v1266_v33  ;;  %v1472_v33 = vld [vmem:[#allocation5 + $0x20] ss:$16 sps:$4 sm:$0xff]  }
 0x544   :  { %1406 = vpow2.f32 %v1267_v6  ;;  %v1476_v6 = vld [vmem:[#allocation5 + $0x40] ss:$16 sps:$4 sm:$0xff]  }
 0x545   :  { %1408 = vtanh.f32 %v800_v38  ;;  %v1477_v38 = vld [vmem:[#allocation5 + $0x48] ss:$16 sps:$4 sm:$0xff]  }
 0x54c   :  { %v1403_v39 = vpop.eup %1402 }
 0x54d   :  { %v1405_v41 = vpop.eup %1404  ;;  %v809_v42 = vadd.f32 1.0, %v1403_v39  ;;  %v1478_v39 = vld [vmem:[#allocation5 + $0x64] ss:$16 sps:$4 sm:$0xff]  }
 0x54e   :  { %v815_v43 = vadd.f32 1.0, %v1405_v41  ;;  %v1407_v44 = vpop.eup %1406  ;;  %v1479_v41 = vld [vmem:[#allocation5 + $0x6c] ss:$16 sps:$4 sm:$0xff]  }
 0x54f   :  { %1410 = vrcp.f32 %v809_v42  ;;  %v1409_v45 = vpop.eup %1408  ;;  %v822_v49 = vadd.f32 1.0, %v1407_v44  ;;  %v1480_v42 = vld [vmem:[#allocation5 + $0x60] ss:$16 sps:$4 sm:$0xff]   ;;  %v1483_v44 = vld [vmem:[#allocation5 + $0x8c] ss:$16 sps:$4 sm:$0xff]  }
 0x550   :  { %1412 = vrcp.f32 %v815_v43  ;;  %v1481_v43 = vld [vmem:[#allocation5 + $0x68] ss:$16 sps:$4 sm:$0xff]  }
 0x551   :  { %1414 = vrcp.f32 %v822_v49  ;;  %v1488_v49 = vld [vmem:[#allocation5 + $0xa0] ss:$16 sps:$4 sm:$0xff]  }
 0x559   :  { %v1411_v46 = vpop.eup %1410 }
 0x55a   :  { %v1413_v47 = vpop.eup %1412  ;;  %v826_v48 = vmul.f32 %v1411_v46, %v1409_v45  ;;  %v1484_v45 = vld [vmem:[#allocation5 + $0x80] ss:$16 sps:$4 sm:$0xff]   ;;  %v1485_v46 = vld [vmem:[#allocation5 + $0x88] ss:$16 sps:$4 sm:$0xff]  }
 0x55b   :  { %v825_v50 = vmul.f32 %v1413_v47, %v1973_v40  ;;  %v1415_v52 = vpop.eup %1414  ;;  %v1486_v47 = vld [vmem:[#allocation5 + $0xa4] ss:$16 sps:$4 sm:$0xff]  }
 0x55d   :  { %v2011_v51 = vadd.f32 %v826_v48, %v825_v50  ;;  %v1487_v48 = vld [vmem:[#allocation5 + $0xac] ss:$16 sps:$4 sm:$0xff]   ;;  %v1489_v50 = vld [vmem:[#allocation5 + $0xa8] ss:$16 sps:$4 sm:$0xff]  }
 0x55f   :  { %1416 = vtanh.f32 %v2011_v51 }
 0x569   :  { %v1417_v35 = vpop.eup %1416 }
 0x56a   :  { %v829_v53 = vmul.f32 %v1417_v35, %v1415_v52  ;;  %v1491_v52 = vld [vmem:[#allocation5 + $0xcc] ss:$16 sps:$4 sm:$0xff]   ;;  %v1492_v35 = vld [vmem:[#allocation5 + $0xc0] ss:$16 sps:$4 sm:$0xff]  }
 0x56c   :  { %831 = vst [vmem:[#allocation8 + $0x20] sm:$0xff] %v829_v53  ;;  %v837_v54 = vpack.c.bf16 %v829_v53, %v829_v53  ;;  %v1493_v53 = vld [vmem:[#allocation5 + $0xc8] ss:$16 sps:$4 sm:$0xff]  }
 0x56e   :  { %871 = vmatmul.mubr.bf16.vlgmr.msra.gmra.mrb[20].mxu0 %v837_v54  ;;  %912 = vmatmul.mubr.bf16.vlgmr.msra.gmra.mrb[20].mxu1 %v837_v54  ;;  %v1494_v54 = vld [vmem:[#allocation5 + $0xe4] ss:$16 sps:$4 sm:$0xff]  }
 0x56f   :  { %953 = vmatpush1.bf16.msra.mxu0 %v1726_v2  ;;  %994 = vmatpush1.bf16.msra.mxu1 %v1739_v7  ;;  %v1466_v2 = vld [vmem:[#allocation5 + $0x4] ss:$16 sps:$4 sm:$0xff]  }
 0x570   :  { %954 = vmatprep.subr.bf16.mxu0 %v1729_v3  ;;  %995 = vmatprep.subr.bf16.mxu1 %v1749_v10  ;;  %v1467_v3 = vld [vmem:[#allocation5 + $0xc] ss:$16 sps:$4 sm:$0xff]  }
 0x571   :  { %984 = vmatprep.mubr.bf16.mxu0 %v1645_v0  ;;  %1025 = vmatprep.mubr.bf16.mxu1 %v1645_v0 }
 0x573   :  { %955 = vmatpush1.bf16.msra.mxu0 %v1732_v4  ;;  %996 = vmatpush1.bf16.msra.mxu1 %v1751_v11  ;;  %v833_v4 = vld [vmem:[#allocation2 + $0xa0] sm:$0xff] }
 0x574   :  { %956 = vmatprep.subr.bf16.mxu0 %v1735_v5  ;;  %997 = vmatprep.subr.bf16.mxu1 %v1759_v14  ;;  %v834_v5 = vld [vmem:[#allocation2 + $0xa8] sm:$0xff] }
 0x577   :  { %957 = vmatpush1.bf16.msra.mxu0 %v1742_v8  ;;  %998 = vmatpush1.bf16.msra.mxu1 %v1763_v15 }
 0x578   :  { %958 = vmatprep.subr.bf16.mxu0 %v1746_v9  ;;  %999 = vmatprep.subr.bf16.mxu1 %v1766_v16 }
 0x57b   :  { %959 = vmatpush1.bf16.msra.mxu0 %v1755_v12  ;;  %1000 = vmatpush1.bf16.msra.mxu1 %v1775_v19  ;;  %v836_v19 = vld [vmem:[#allocation2 + $0xb8] sm:$0xff] }
 0x57c   :  { %960 = vmatprep.subr.bf16.mxu0 %v1757_v13  ;;  %1001 = vmatprep.subr.bf16.mxu1 %v1778_v20 }
 0x57f   :  { %961 = vmatpush1.bf16.msra.mxu0 %v1769_v17  ;;  %1002 = vmatpush1.bf16.msra.mxu1 %v1787_v23 }
 0x580   :  { %962 = vmatprep.subr.bf16.mxu0 %v1772_v18  ;;  %1003 = vmatprep.subr.bf16.mxu1 %v1790_v24 }
 0x583   :  { %963 = vmatpush1.bf16.msra.mxu0 %v1780_v21  ;;  %1004 = vmatpush1.bf16.msra.mxu1 %v1799_v27  ;;  %v835_v21 = vld [vmem:[#allocation2 + $0xb0] sm:$0xff] }
 0x584   :  { %964 = vmatprep.subr.bf16.mxu0 %v1783_v22  ;;  %1005 = vmatprep.subr.bf16.mxu1 %v1802_v28 }
 0x587   :  { %965 = vmatpush1.bf16.msra.mxu0 %v1793_v25  ;;  %1006 = vmatpush1.bf16.msra.mxu1 %v1809_v31 }
 0x588   :  { %966 = vmatprep.subr.bf16.mxu0 %v1796_v26  ;;  %1007 = vmatprep.subr.bf16.mxu1 %v1812_v32 }
 0x58b   :  { %967 = vmatpush1.bf16.msra.mxu0 %v1805_v29  ;;  %1008 = vmatpush1.bf16.msra.mxu1 %v1816_v34 }
 0x58c   :  { %1066 = vmatprep.subr.bf16.mxu0 %v1466_v2  ;;  %1107 = vmatprep.subr.bf16.mxu1 %v1467_v3  ;;  %v1495_v2 = vld [vmem:[#allocation5 + $0xec] ss:$16 sps:$4 sm:$0xff]   ;;  %v1496_v3 = vld [vmem:[#allocation5 + $0xe0] ss:$16 sps:$4 sm:$0xff]  }
 0x641   :  { %v872_v7 = vpop.f32.mrb[20].mxu0  ;;  %v913_v8 = vpop.f32.mrb[20].mxu1 }
 0x642   :  { %v873_v9 = vadd.f32 %v872_v7, %v833_v4  ;;  %v874_v10 = vpop.f32.mrb[21].mxu0  ;;  %v915_v11 = vpop.f32.mrb[21].mxu1  ;;  %v914_v23 = vadd.f32 %v913_v8, %v835_v21  ;;  %v1497_v4 = vld [vmem:[#allocation5 + $0xe8] ss:$16 sps:$4 sm:$0xff]  }
 0x643   :  { %v875_v12 = vadd.f32 %v874_v10, %v834_v5  ;;  %v876_v13 = vpop.f32.mrb[22].mxu0  ;;  %v917_v14 = vpop.f32.mrb[22].mxu1  ;;  %v916_v20 = vadd.f32 %v915_v11, %v836_v19  ;;  %v947_v5 = vld [vmem:[#allocation2 + $0xc0] sm:$0xff]  ;;  %v948_v7 = vld [vmem:[#allocation2 + $0xc8] sm:$0xff] }
 0x644   :  { %v1268_v15 = vmul.f32 -1.442695, %v873_v9  ;;  %v877_v16 = vpop.f32.mrb[23].mxu0  ;;  %v918_v17 = vpop.f32.mrb[23].mxu1 }
 0x645   :  { %v1269_v18 = vmul.f32 -1.442695, %v875_v12  ;;  %v1270_v22 = vmul.f32 -1.442695, %v916_v20  ;;  %v950_v20 = vld [vmem:[#allocation2 + $0xd8] sm:$0xff] }
 0x646   :  { %1418 = vpow2.f32 %v1268_v15 }
 0x647   :  { %1420 = vpow2.f32 %v1269_v18 }
 0x648   :  { %1422 = vpow2.f32 %v1270_v22  ;;  %v949_v22 = vld [vmem:[#allocation2 + $0xd0] sm:$0xff] }
 0x649   :  { %1424 = vtanh.f32 %v914_v23 }
 0x650   :  { %v1419_v24 = vpop.eup %1418 }
 0x651   :  { %v1421_v25 = vpop.eup %1420  ;;  %v923_v26 = vadd.f32 1.0, %v1419_v24 }
 0x652   :  { %v929_v27 = vadd.f32 1.0, %v1421_v25  ;;  %v1423_v28 = vpop.eup %1422 }
 0x653   :  { %1426 = vrcp.f32 %v923_v26  ;;  %v1425_v29 = vpop.eup %1424  ;;  %v936_v40 = vadd.f32 1.0, %v1423_v28 }
 0x654   :  { %1428 = vrcp.f32 %v929_v27 }
 0x655   :  { %1430 = vrcp.f32 %v936_v40 }
 0x65d   :  { %v1427_v31 = vpop.eup %1426 }
 0x65e   :  { %v1429_v32 = vpop.eup %1428  ;;  %v940_v34 = vmul.f32 %v1427_v31, %v1425_v29 }
 0x65f   :  { %v939_v55 = vmul.f32 %v1429_v32, %v2011_v51  ;;  %v1431_v57 = vpop.eup %1430  ;;  %v1490_v51 = vld [vmem:[#allocation5 + $0xc4] ss:$16 sps:$4 sm:$0xff]  }
 0x661   :  { %v2047_v56 = vadd.f32 %v940_v34, %v939_v55 }
 0x663   :  { %1432 = vtanh.f32 %v2047_v56 }
 0x66d   :  { %v1433_v58 = vpop.eup %1432 }
 0x66e   :  { %v943_v59 = vmul.f32 %v1433_v58, %v1431_v57 }
 0x670   :  { %945 = vst [vmem:[#allocation8 + $0x28] sm:$0xff] %v943_v59  ;;  %v951_v60 = vpack.c.bf16 %v943_v59, %v943_v59 }
 0x672   :  { %985 = vmatmul.mubr.bf16.vlgmr.msra.gmra.mrb[24].mxu0 %v951_v60  ;;  %1026 = vmatmul.mubr.bf16.vlgmr.msra.gmra.mrb[24].mxu1 %v951_v60 }
 0x673   :  { %1067 = vmatpush1.bf16.msra.mxu0 %v1468_v61  ;;  %1108 = vmatpush1.bf16.msra.mxu1 %v1469_v62 }
 0x674   :  { %1068 = vmatprep.subr.bf16.mxu0 %v1470_v63  ;;  %1109 = vmatprep.subr.bf16.mxu1 %v1471_v30  ;;  %v1061_v63 = vld [vmem:[#allocation2 + $0xe0] sm:$0xff]  ;;  %v1062_v30 = vld [vmem:[#allocation2 + $0xe8] sm:$0xff] }
 0x675   :  { %1098 = vmatprep.mubr.bf16.mxu0 %v1645_v0  ;;  %1139 = vmatprep.mubr.bf16.mxu1 %v1645_v0  ;;  %v1482_v0 = vld [vmem:[#allocation5 + $0x84] ss:$16 sps:$4 sm:$0xff]  }
 0x677   :  { %1069 = vmatpush1.bf16.msra.mxu0 %v1472_v33  ;;  %1110 = vmatpush1.bf16.msra.mxu1 %v1473_v36 }
 0x678   :  { %1070 = vmatprep.subr.bf16.mxu0 %v1474_v1  ;;  %1111 = vmatprep.subr.bf16.mxu1 %v1475_v37 }
 0x67b   :  { %1071 = vmatpush1.bf16.msra.mxu0 %v1476_v6  ;;  %1112 = vmatpush1.bf16.msra.mxu1 %v1477_v38 }
 0x67c   :  { %1072 = vmatprep.subr.bf16.mxu0 %v1478_v39  ;;  %1113 = vmatprep.subr.bf16.mxu1 %v1479_v41 }
 0x67f   :  { %1073 = vmatpush1.bf16.msra.mxu0 %v1480_v42  ;;  %1114 = vmatpush1.bf16.msra.mxu1 %v1481_v43 }
 0x680   :  { %1074 = vmatprep.subr.bf16.mxu0 %v1482_v0  ;;  %1115 = vmatprep.subr.bf16.mxu1 %v1483_v44  ;;  %v1064_v44 = vld [vmem:[#allocation2 + $0xf8] sm:$0xff] }
 0x683   :  { %1075 = vmatpush1.bf16.msra.mxu0 %v1484_v45  ;;  %1116 = vmatpush1.bf16.msra.mxu1 %v1485_v46  ;;  %v1063_v46 = vld [vmem:[#allocation2 + $0xf0] sm:$0xff] }
 0x684   :  { %1076 = vmatprep.subr.bf16.mxu0 %v1486_v47  ;;  %1117 = vmatprep.subr.bf16.mxu1 %v1487_v48 }
 0x687   :  { %1077 = vmatpush1.bf16.msra.mxu0 %v1488_v49  ;;  %1118 = vmatpush1.bf16.msra.mxu1 %v1489_v50 }
 0x688   :  { %1078 = vmatprep.subr.bf16.mxu0 %v1490_v51  ;;  %1119 = vmatprep.subr.bf16.mxu1 %v1491_v52 }
 0x68b   :  { %1079 = vmatpush1.bf16.msra.mxu0 %v1492_v35  ;;  %1120 = vmatpush1.bf16.msra.mxu1 %v1493_v53 }
 0x68c   :  { %1080 = vmatprep.subr.bf16.mxu0 %v1494_v54  ;;  %1121 = vmatprep.subr.bf16.mxu1 %v1495_v2 }
 0x68f   :  { %1081 = vmatpush1.bf16.msra.mxu0 %v1496_v3  ;;  %1122 = vmatpush1.bf16.msra.mxu1 %v1497_v4 }
 0x745   :  { %v986_v8 = vpop.f32.mrb[24].mxu0  ;;  %v1027_v9 = vpop.f32.mrb[24].mxu1 }
 0x746   :  { %v987_v10 = vadd.f32 %v986_v8, %v947_v5  ;;  %v988_v11 = vpop.f32.mrb[25].mxu0  ;;  %v1029_v12 = vpop.f32.mrb[25].mxu1  ;;  %v1028_v24 = vadd.f32 %v1027_v9, %v949_v22 }
 0x747   :  { %v989_v13 = vadd.f32 %v988_v11, %v948_v7  ;;  %v990_v14 = vpop.f32.mrb[26].mxu0  ;;  %v1031_v15 = vpop.f32.mrb[26].mxu1  ;;  %v1030_v21 = vadd.f32 %v1029_v12, %v950_v20 }
 0x748   :  { %v1271_v16 = vmul.f32 -1.442695, %v987_v10  ;;  %v991_v17 = vpop.f32.mrb[27].mxu0  ;;  %v1032_v18 = vpop.f32.mrb[27].mxu1 }
 0x749   :  { %v1272_v19 = vmul.f32 -1.442695, %v989_v13  ;;  %v1273_v23 = vmul.f32 -1.442695, %v1030_v21 }
 0x74a   :  { %1434 = vpow2.f32 %v1271_v16 }
 0x74b   :  { %1436 = vpow2.f32 %v1272_v19 }
 0x74c   :  { %1438 = vpow2.f32 %v1273_v23 }
 0x74d   :  { %1440 = vtanh.f32 %v1028_v24 }
 0x754   :  { %v1435_v25 = vpop.eup %1434 }
 0x755   :  { %v1437_v26 = vpop.eup %1436  ;;  %v1037_v27 = vadd.f32 1.0, %v1435_v25 }
 0x756   :  { %v1043_v28 = vadd.f32 1.0, %v1437_v26  ;;  %v1439_v29 = vpop.eup %1438 }
 0x757   :  { %1442 = vrcp.f32 %v1037_v27  ;;  %v1441_v31 = vpop.eup %1440  ;;  %v1050_v55 = vadd.f32 1.0, %v1439_v29 }
 0x758   :  { %1444 = vrcp.f32 %v1043_v28 }
 0x759   :  { %1446 = vrcp.f32 %v1050_v55 }
 0x761   :  { %v1443_v32 = vpop.eup %1442 }
 0x762   :  { %v1445_v34 = vpop.eup %1444  ;;  %v1054_v40 = vmul.f32 %v1443_v32, %v1441_v31 }
 0x763   :  { %v1053_v57 = vmul.f32 %v1445_v34, %v2047_v56  ;;  %v1447_v59 = vpop.eup %1446 }
 0x765   :  { %v1055_v58 = vadd.f32 %v1054_v40, %v1053_v57 }
 0x767   :  { %1448 = vtanh.f32 %v1055_v58 }
 0x771   :  { %v1449_v60 = vpop.eup %1448 }
 0x772   :  { %v1057_v61 = vmul.f32 %v1449_v60, %v1447_v59 }
 0x774   :  { %1059 = vst [vmem:[#allocation8 + $0x30] sm:$0xff] %v1057_v61  ;;  %v1065_v62 = vpack.c.bf16 %v1057_v61, %v1057_v61 }
 0x776   :  { %1099 = vmatmul.mubr.bf16.vlgmr.msra.gmra.mrb[28].mxu0 %v1065_v62  ;;  %1140 = vmatmul.mubr.bf16.vlgmr.msra.gmra.mrb[28].mxu1 %v1065_v62 }
 0x849   :  { %v1100_v33 = vpop.f32.mrb[28].mxu0  ;;  %v1141_v36 = vpop.f32.mrb[28].mxu1 }
 0x84a   :  { %v1101_v1 = vadd.f32 %v1100_v33, %v1061_v63  ;;  %v1102_v37 = vpop.f32.mrb[29].mxu0  ;;  %v1143_v6 = vpop.f32.mrb[29].mxu1  ;;  %v1142_v48 = vadd.f32 %v1141_v36, %v1063_v46 }
 0x84b   :  { %v1103_v38 = vadd.f32 %v1102_v37, %v1062_v30  ;;  %v1104_v39 = vpop.f32.mrb[30].mxu0  ;;  %v1145_v56 = vpop.f32.mrb[30].mxu1  ;;  %v1144_v45 = vadd.f32 %v1143_v6, %v1064_v44 }
 0x84c   :  { %v1274_v41 = vmul.f32 -1.442695, %v1101_v1  ;;  %v1105_v42 = vpop.f32.mrb[31].mxu0  ;;  %v1146_v43 = vpop.f32.mrb[31].mxu1 }
 0x84d   :  { %v1275_v0 = vmul.f32 -1.442695, %v1103_v38  ;;  %v1276_v47 = vmul.f32 -1.442695, %v1144_v45 }
 0x84e   :  { %1450 = vpow2.f32 %v1274_v41 }
 0x84f   :  { %1452 = vpow2.f32 %v1275_v0 }
 0x850   :  { %1454 = vpow2.f32 %v1276_v47 }
 0x851   :  { %1456 = vtanh.f32 %v1142_v48 }
 0x858   :  { %v1451_v49 = vpop.eup %1450 }
 0x859   :  { %v1453_v50 = vpop.eup %1452  ;;  %v1151_v51 = vadd.f32 1.0, %v1451_v49 }
 0x85a   :  { %v1157_v52 = vadd.f32 1.0, %v1453_v50  ;;  %v1455_v35 = vpop.eup %1454 }
 0x85b   :  { %1458 = vrcp.f32 %v1151_v51  ;;  %v1457_v53 = vpop.eup %1456  ;;  %v1164_v4 = vadd.f32 1.0, %v1455_v35 }
 0x85c   :  { %1460 = vrcp.f32 %v1157_v52 }
 0x85d   :  { %1462 = vrcp.f32 %v1164_v4 }
 0x865   :  { %v1459_v54 = vpop.eup %1458 }
 0x866   :  { %v1461_v2 = vpop.eup %1460  ;;  %v1168_v3 = vmul.f32 %v1459_v54, %v1457_v53 }
 0x867   :  { %v1167_v5 = vmul.f32 %v1461_v2, %v1055_v58  ;;  %v1463_v8 = vpop.eup %1462 }
 0x869   :  { %v1169_v7 = vadd.f32 %v1168_v3, %v1167_v5 }
 0x86b   :  { %1464 = vtanh.f32 %v1169_v7  ;;  %1175 = vst [vmem:[#allocation11] sm:$0xff] %v1169_v7 }
 0x875   :  { %v1465_v9 = vpop.eup %1464 }
 0x876   :  { %v1171_v10 = vmul.f32 %v1465_v9, %v1463_v8 }
 0x878   :  { %1173 = vst [vmem:[#allocation8 + $0x38] sm:$0xff] %v1171_v10  ;;  %1174 = vst [vmem:[#allocation9] sm:$0xff] %v1171_v10 }
 0x879   :  { %1575 = shalt.err (!%p1572_p0)
}
 0x87a   :  { %s1576_s20 = scalar_lea.hbm %s2108_s5, 128 }
 0x87b   :  { %p1577_p1 = scmp.ne.s32.totalorder %s2108_s5, %s1576_s20  ;;  %p1580_p2 = scmp.lt.u32.totalorder %s1576_s20, %s2108_s5 }
 0x87d   :  { %p1582_p3 = pnand %p1580_p2, %p1577_p1 }
 0x87f   :  { %1585 = shalt.err (!%p1582_p3)
}
 0x880   :  { %1197 = dma.vmem_to_hbm [thread:$0]  %s1195_s12, 128, %s2108_s5, [#allocation10]  }
 0x881   :  { %s1586_s26 = scalar_lea.vmem %s2053_s14, 1024  ;;  %p1591_p5 = scmp.lt.s32.totalorder %s2053_s14, %s2053_s14 }
 0x882   :  { %p1587_p4 = scmp.ne.s32.totalorder %s2053_s14, %s1586_s26  ;;  %p1592_p6 = scmp.lt.s32.totalorder %s1586_s26, %s1586_s26 }
 0x884   :  { %p1593_p7 = por %p1592_p6, %p1591_p5 }
 0x886   :  { %p1594_p8 = pnand %p1593_p7, %p1587_p4 }
 0x888   :  { %1597 = shalt.err (!%p1594_p8)
}
 0x889   :  { %s1598_s29 = scalar_lea.hbm %s2107_s4, 1024 }
 0x88a   :  { %p1599_p9 = scmp.ne.s32.totalorder %s2107_s4, %s1598_s29  ;;  %p1602_p10 = scmp.lt.u32.totalorder %s1598_s29, %s2107_s4 }
 0x88c   :  { %p1604_p11 = pnand %p1602_p10, %p1599_p9 }
 0x88e   :  { %1607 = shalt.err (!%p1604_p11)
}
 0x88f   :  { %s1649_s5 = smov 128   ;;  %s1650_s0 = smov 8  }
 0x890   :  { %1187 = dma.vmem_to_hbm [thread:$0]  %s2053_s14, 1024, %s2107_s4, [#allocation4], %s1649_s5, %s1649_s5, %s1650_s0  }
 0x891   :  { %s1608_s11 = scalar_lea.vmem %s2055_s16, 128  ;;  %p1613_p13 = scmp.lt.s32.totalorder %s2055_s16, %s2055_s16 }
 0x892   :  { %p1609_p12 = scmp.ne.s32.totalorder %s2055_s16, %s1608_s11  ;;  %p1614_p0 = scmp.lt.s32.totalorder %s1608_s11, %s1608_s11 }
 0x894   :  { %p1615_p1 = por %p1614_p0, %p1613_p13 }
 0x896   :  { %p1616_p2 = pnand %p1615_p1, %p1609_p12 }
 0x898   :  { %1619 = shalt.err (!%p1616_p2)
}
 0x899   :  { %s1620_s13 = scalar_lea.hbm %s2109_s6, 128 }
 0x89a   :  { %p1621_p3 = scmp.ne.s32.totalorder %s2109_s6, %s1620_s13  ;;  %p1624_p4 = scmp.lt.u32.totalorder %s1620_s13, %s2109_s6 }
 0x89c   :  { %p1626_p5 = pnand %p1624_p4, %p1621_p3 }
 0x89e   :  { %1629 = shalt.err (!%p1626_p5)
}
 0x89f   :  { %1207 = dma.vmem_to_hbm [thread:$0]  %s2055_s16, 128, %s2109_s6, [#allocation10]  }
 0x8a0   :  { %1634 = dma.done.wait [#allocation4], 1024  }
 0x8a1   :  { %1635 = vsyncadd [#allocation4], 4294966272 }
 0x8a2   :  { %1636 = dma.done.wait [#allocation10], 256  }
 0x8a3   :  { %1637 = vsyncadd [#allocation10], 4294967040 }
 0x8a4   :  { %1217 = vsyncpa [#allocation3], 1 }
 0x8a5   :  { %1218 = vsyncpa [#allocation6], 1 }
 0x8a6   :  { %1219 = vsyncpa [#allocation4], 1 }
 0x8a7   :  { %1220 = vsyncpa [#allocation10], 1 }

</bundles_post_ra>
